<compile_context>
chip_gen: v7x
topology: tpu7x:2x2x1
jax: 0.10.0
libtpu: 0.0.40
codegen_flags: <defaults>
</compile_context>

<pallas_src>
import functools

import jax
import jax.numpy as jnp
import numpy as np
from jax.experimental import pallas as pl
from jax.experimental.pallas import tpu as pltpu


# ----------------------------------------------------------------------------
# Fused Pallas kernel
# ----------------------------------------------------------------------------
def _fused_lstm_critic_kernel(*refs, num_layers, hidden, seq_len):
    """normalize -> stacked LSTM -> last-layer Linear, all in VMEM.

    refs layout (inputs, then outputs, then scratch):
      x_ref        (T, B, D)    raw state, time-major
      mean_ref     (1, D)       Welford mean
      inv_std_ref  (1, D)       1 / sqrt(mean_diff / n)
      [W_ih_l (Din_l, 4H), W_hh_l (H, 4H), b_l (1, 4H)]  per layer
      w_out_ref    (1, H)       critic_last_layer weight (normc rows)
      b_out_ref    (1, 1)       critic_last_layer bias
      o_ref        (B, 1)       V(s) output
      buf_scr      (T, B, H)    inter-layer per-timestep outputs (scratch)
      xg_scr       (T, B, 4H)   input-side gate projections (scratch)
    """
    x_ref = refs[0]
    mean_ref = refs[1]
    inv_std_ref = refs[2]
    layer_refs = refs[3:3 + 3 * num_layers]
    w_out_ref = refs[3 + 3 * num_layers]
    b_out_ref = refs[4 + 3 * num_layers]
    o_ref = refs[5 + 3 * num_layers]
    buf_scr = refs[6 + 3 * num_layers]
    xg_scr = refs[7 + 3 * num_layers]

    B = x_ref.shape[1]
    H = hidden
    T = seq_len

    h_top = None
    for layer in range(num_layers):
        wx_ref = layer_refs[3 * layer + 0]   # (Din, 4H)
        wh_ref = layer_refs[3 * layer + 1]   # (H, 4H)
        b_ref = layer_refs[3 * layer + 2]    # (1, 4H)
        is_first = (layer == 0)
        is_last = (layer == num_layers - 1)

        # --- Phase 1: input-side gate projections for every timestep. -------
        # Independent of the recurrence -> the unrolled loop lets the
        # scheduler pipeline all T small matmuls and moves x@W_ih plus the
        # bias add off the recurrent critical path.
        def proj(t, carry, wx_ref=wx_ref, b_ref=b_ref, is_first=is_first):
            if is_first:
                # normalize_state fused in (update_norm=False path).
                x_t = (x_ref[t] - mean_ref[...]) * inv_std_ref[...]
            else:
                x_t = buf_scr[t]
            xg_scr[t] = (jnp.dot(x_t, wx_ref[...],
                                 preferred_element_type=jnp.float32)
                         + b_ref[...])
            return carry

        jax.lax.fori_loop(0, T, proj, 0, unroll=True)

        # --- Phase 2: recurrence, one MXU push per step on the crit path. ---
        def step(t, carry, wh_ref=wh_ref, is_last=is_last):
            h_prev, c_prev = carry
            gates = xg_scr[t] + jnp.dot(h_prev, wh_ref[...],
                                        preferred_element_type=jnp.float32)
            # Full-width EUP activations on the (B, 4H = 128-lane) vreg,
            # then pick the [i, f, g, o] slabs (PyTorch gate order).
            sig = jax.nn.sigmoid(gates)
            tnh = jnp.tanh(gates)
            i = sig[:, 0 * H:1 * H]
            f = sig[:, 1 * H:2 * H]
            g = tnh[:, 2 * H:3 * H]
            o = sig[:, 3 * H:4 * H]
            c = f * c_prev + i * g
            h = o * jnp.tanh(c)
            if not is_last:          # next layer's phase-1 input
                buf_scr[t] = h
            return (h, c)

        h0 = jnp.zeros((B, H), jnp.float32)
        c0 = jnp.zeros((B, H), jnp.float32)
        h_top, _ = jax.lax.fori_loop(0, T, step, (h0, c0), unroll=True)

    # critic_last_layer fused: (B, H) * (1, H) -> lane reduce -> (B, 1).
    o_ref[...] = (jnp.sum(h_top * w_out_ref[...], axis=-1, keepdims=True)
                  + b_out_ref[...])


# ----------------------------------------------------------------------------
# LSTMCritic in JAX / Pallas
# ----------------------------------------------------------------------------
class LSTMCriticPallas:
    def __init__(self, input_dim, layers, key):
        if len(layers) < 1:
            raise ValueError("layers must be non-empty")
        hidden = layers[0]
        for h in layers:
            if h != hidden:
                raise ValueError("all layers must share the same hidden size")

        self.input_dim = input_dim
        self.hidden = hidden
        self.num_layers = len(layers)

        # Welford normalization state (fresh module: n == 1; with
        # update_norm=False the normalization is the identity; formula kept).
        self.welford_mean = jnp.zeros((1, input_dim), jnp.float32)
        self.welford_mean_diff = jnp.ones((1, input_dim), jnp.float32)
        self.welford_n = 1.0
        self.inv_std = 1.0 / jnp.sqrt(self.welford_mean_diff / self.welford_n)
        # TODO(synk): the Welford running-statistics update path
        # (update_normalization_param=True on 1-D inputs) and the persistent
        # hidden-state (hx) carry/reset across calls are host-side stateful
        # bookkeeping and are not part of this fused forward kernel.

        # LSTM params: PyTorch default init uniform(-k, k), k = 1/sqrt(H).
        k = 1.0 / np.sqrt(hidden)
        self.lstm_params = []
        for layer in range(self.num_layers):
            d_in = input_dim if layer == 0 else hidden
            key, k1, k2, k3, k4 = jax.random.split(key, 5)
            w_ih = jax.random.uniform(k1, (4 * hidden, d_in), jnp.float32, -k, k)
            w_hh = jax.random.uniform(k2, (4 * hidden, hidden), jnp.float32, -k, k)
            b_ih = jax.random.uniform(k3, (4 * hidden,), jnp.float32, -k, k)
            b_hh = jax.random.uniform(k4, (4 * hidden,), jnp.float32, -k, k)
            # pre-transpose + fold biases for the kernel
            self.lstm_params.append((w_ih.T, w_hh.T, (b_ih + b_hh)[None, :]))

        # critic_last_layer: normc init (rows of N(0,1) scaled to unit norm).
        key, kw = jax.random.split(key)
        w_out = jax.random.normal(kw, (1, hidden), jnp.float32)
        self.w_out = w_out / jnp.sqrt(jnp.sum(w_out ** 2, axis=1, keepdims=True))
        self.b_out = jnp.zeros((1, 1), jnp.float32)

    def __call__(self, state):
        # _base_forward: add seq dim if 2-D, like x.unsqueeze(0) in PyTorch.
        x = state[None] if state.ndim == 2 else state        # (T, B, D)
        T, B, _ = x.shape

        flat_inputs = [x, self.welford_mean, self.inv_std]
        for (w_x, w_h, b) in self.lstm_params:
            flat_inputs += [w_x, w_h, b]
        flat_inputs += [self.w_out, self.b_out]

        kernel = functools.partial(
            _fused_lstm_critic_kernel,
            num_layers=self.num_layers, hidden=self.hidden, seq_len=T)
        vmem = pltpu.MemorySpace.VMEM
        return pl.pallas_call(
            kernel,
            out_shape=jax.ShapeDtypeStruct((B, 1), jnp.float32),
            in_specs=[pl.BlockSpec(memory_space=vmem) for _ in flat_inputs],
            out_specs=pl.BlockSpec(memory_space=vmem),
            scratch_shapes=[
                pltpu.VMEM((T, B, self.hidden), jnp.float32),      # layer outs
                pltpu.VMEM((T, B, 4 * self.hidden), jnp.float32),  # gate proj
            ],
            compiler_params=pltpu.CompilerParams(
                vmem_limit_bytes=32 * 1024 * 1024),
        )(*flat_inputs)


# ----------------------------------------------------------------------------
# Pure-JAX reference (for correctness check)
# ----------------------------------------------------------------------------
def lstm_critic_ref(model, state):
    x = (state - model.welford_mean) * model.inv_std
    x = x[None] if x.ndim == 2 else x
    H = model.hidden
    for (w_x, w_h, b) in model.lstm_params:
        B = x.shape[1]

        def step(carry, xt):
            h, c = carry
            gates = xt @ w_x + h @ w_h + b
            i = jax.nn.sigmoid(gates[:, 0 * H:1 * H])
            f = jax.nn.sigmoid(gates[:, 1 * H:2 * H])
            g = jnp.tanh(gates[:, 2 * H:3 * H])
            o = jax.nn.sigmoid(gates[:, 3 * H:4 * H])
            c = f * c + i * g
            h = o * jnp.tanh(c)
            return (h, c), h

        init = (jnp.zeros((B, H), jnp.float32), jnp.zeros((B, H), jnp.float32))
        _, ys = jax.lax.scan(step, init, x)
        x = ys
    return x[-1] @ model.w_out.T + model.b_out


# ----------------------------------------------------------------------------
if __name__ == "__main__":
    key = jax.random.PRNGKey(0)
    key, k_model, k_state = jax.random.split(key, 3)

    T, B, IN_DIM = 8, 2, 16
    LAYERS = [32, 32]

    model = LSTMCriticPallas(IN_DIM, LAYERS, k_model)

    # 3-D (seq, batch, dim) rollout input.
    state_seq = jax.random.normal(k_state, (T, B, IN_DIM), jnp.float32)
    value_seq = jax.block_until_ready(model(state_seq))
    ref_seq = jax.block_until_ready(lstm_critic_ref(model, state_seq))
    np.testing.assert_allclose(np.asarray(value_seq), np.asarray(ref_seq),
                               rtol=1e-5, atol=1e-5)
    assert value_seq.shape == (B, 1)

    # 2-D (batch, dim) single-step input (unsqueeze path).
    state_step = state_seq[0]
    value_step = jax.block_until_ready(model(state_step))
    ref_step = jax.block_until_ready(lstm_critic_ref(model, state_step))
    np.testing.assert_allclose(np.asarray(value_step), np.asarray(ref_step),
                               rtol=1e-5, atol=1e-5)
    assert value_step.shape == (B, 1)

    print("KERNEL_OK")
</pallas_src>

<mosaic_0001>
module attributes {stable_mosaic.version = 11 : i64} {
  func.func @_fused_lstm_critic_kernel(%arg0: memref<8x2x16xf32, #tpu.memory_space<vmem>>, %arg1: memref<1x16xf32, #tpu.memory_space<vmem>>, %arg2: memref<1x16xf32, #tpu.memory_space<vmem>>, %arg3: memref<16x128xf32, #tpu.memory_space<vmem>>, %arg4: memref<32x128xf32, #tpu.memory_space<vmem>>, %arg5: memref<1x128xf32, #tpu.memory_space<vmem>>, %arg6: memref<32x128xf32, #tpu.memory_space<vmem>>, %arg7: memref<32x128xf32, #tpu.memory_space<vmem>>, %arg8: memref<1x128xf32, #tpu.memory_space<vmem>>, %arg9: memref<1x32xf32, #tpu.memory_space<vmem>>, %arg10: memref<1x1xf32, #tpu.memory_space<vmem>>, %arg11: memref<2x1xf32, #tpu.memory_space<vmem>>, %arg12: memref<8x2x32xf32, #tpu.memory_space<vmem>>, %arg13: memref<8x2x128xf32, #tpu.memory_space<vmem>>) attributes {dimension_semantics = [], scalar_prefetch = 0 : i64, scratch_operands = 2 : i64, tpu.core_type = #tpu.core_type<tc>} {
    %c0_i32 = arith.constant 0 : i32
    %0 = arith.index_cast %c0_i32 : i32 to index
    %c0 = arith.constant 0 : index
    %c0_0 = arith.constant 0 : index
    %1 = vector.load %arg0[%0, %c0, %c0_0] : memref<8x2x16xf32, #tpu.memory_space<vmem>>, vector<1x2x16xf32>
    %2 = vector.shape_cast %1 : vector<1x2x16xf32> to vector<2x16xf32>
    %c0_1 = arith.constant 0 : index
    %c0_2 = arith.constant 0 : index
    %3 = vector.load %arg1[%c0_1, %c0_2] : memref<1x16xf32, #tpu.memory_space<vmem>>, vector<1x16xf32>
    %4 = vector.broadcast %3 : vector<1x16xf32> to vector<2x16xf32>
    %5 = arith.subf %2, %4 : vector<2x16xf32>
    %c0_3 = arith.constant 0 : index
    %c0_4 = arith.constant 0 : index
    %6 = vector.load %arg2[%c0_3, %c0_4] : memref<1x16xf32, #tpu.memory_space<vmem>>, vector<1x16xf32>
    %7 = vector.broadcast %6 : vector<1x16xf32> to vector<2x16xf32>
    %8 = arith.mulf %5, %7 : vector<2x16xf32>
    %c0_5 = arith.constant 0 : index
    %c0_6 = arith.constant 0 : index
    %9 = vector.load %arg3[%c0_5, %c0_6] : memref<16x128xf32, #tpu.memory_space<vmem>>, vector<16x128xf32>
    %cst = arith.constant dense<0.000000e+00> : vector<2x128xf32>
    %10 = tpu.matmul %8, %9, %cst {dimension_numbers = #tpu.dot_dimension_numbers<[1], [0], [0], [1], [0, 0, 1, 1], [], []>} : vector<2x16xf32>, vector<16x128xf32>, vector<2x128xf32> -> vector<2x128xf32>
    %c0_7 = arith.constant 0 : index
    %c0_8 = arith.constant 0 : index
    %11 = vector.load %arg5[%c0_7, %c0_8] : memref<1x128xf32, #tpu.memory_space<vmem>>, vector<1x128xf32>
    %12 = vector.broadcast %11 : vector<1x128xf32> to vector<2x128xf32>
    %13 = arith.addf %10, %12 : vector<2x128xf32>
    %14 = arith.index_cast %c0_i32 : i32 to index
    %c0_9 = arith.constant 0 : index
    %c0_10 = arith.constant 0 : index
    %15 = vector.load %arg13[%14, %c0_9, %c0_10] : memref<8x2x128xf32, #tpu.memory_space<vmem>>, vector<1x2x128xf32>
    %16 = vector.shape_cast %15 : vector<1x2x128xf32> to vector<2x128xf32>
    %17 = vector.shape_cast %13 : vector<2x128xf32> to vector<1x2x128xf32>
    tpu.vector_store %arg13[%14, %c0_9, %c0_10], %17 {strides = array<i32>} : memref<8x2x128xf32, #tpu.memory_space<vmem>>, vector<1x2x128xf32>,
    %c1_i32 = arith.constant 1 : i32
    %18 = arith.index_cast %c1_i32 : i32 to index
    %c0_11 = arith.constant 0 : index
    %c0_12 = arith.constant 0 : index
    %19 = vector.load %arg0[%18, %c0_11, %c0_12] : memref<8x2x16xf32, #tpu.memory_space<vmem>>, vector<1x2x16xf32>
    %20 = vector.shape_cast %19 : vector<1x2x16xf32> to vector<2x16xf32>
    %c0_13 = arith.constant 0 : index
    %c0_14 = arith.constant 0 : index
    %21 = vector.load %arg1[%c0_13, %c0_14] : memref<1x16xf32, #tpu.memory_space<vmem>>, vector<1x16xf32>
    %22 = vector.broadcast %21 : vector<1x16xf32> to vector<2x16xf32>
    %23 = arith.subf %20, %22 : vector<2x16xf32>
    %c0_15 = arith.constant 0 : index
    %c0_16 = arith.constant 0 : index
    %24 = vector.load %arg2[%c0_15, %c0_16] : memref<1x16xf32, #tpu.memory_space<vmem>>, vector<1x16xf32>
    %25 = vector.broadcast %24 : vector<1x16xf32> to vector<2x16xf32>
    %26 = arith.mulf %23, %25 : vector<2x16xf32>
    %c0_17 = arith.constant 0 : index
    %c0_18 = arith.constant 0 : index
    %27 = vector.load %arg3[%c0_17, %c0_18] : memref<16x128xf32, #tpu.memory_space<vmem>>, vector<16x128xf32>
    %cst_19 = arith.constant dense<0.000000e+00> : vector<2x128xf32>
    %28 = tpu.matmul %26, %27, %cst_19 {dimension_numbers = #tpu.dot_dimension_numbers<[1], [0], [0], [1], [0, 0, 1, 1], [], []>} : vector<2x16xf32>, vector<16x128xf32>, vector<2x128xf32> -> vector<2x128xf32>
    %c0_20 = arith.constant 0 : index
    %c0_21 = arith.constant 0 : index
    %29 = vector.load %arg5[%c0_20, %c0_21] : memref<1x128xf32, #tpu.memory_space<vmem>>, vector<1x128xf32>
    %30 = vector.broadcast %29 : vector<1x128xf32> to vector<2x128xf32>
    %31 = arith.addf %28, %30 : vector<2x128xf32>
    %32 = arith.index_cast %c1_i32 : i32 to index
    %c0_22 = arith.constant 0 : index
    %c0_23 = arith.constant 0 : index
    %33 = vector.load %arg13[%32, %c0_22, %c0_23] : memref<8x2x128xf32, #tpu.memory_space<vmem>>, vector<1x2x128xf32>
    %34 = vector.shape_cast %33 : vector<1x2x128xf32> to vector<2x128xf32>
    %35 = vector.shape_cast %31 : vector<2x128xf32> to vector<1x2x128xf32>
    tpu.vector_store %arg13[%32, %c0_22, %c0_23], %35 {strides = array<i32>} : memref<8x2x128xf32, #tpu.memory_space<vmem>>, vector<1x2x128xf32>,
    %c2_i32 = arith.constant 2 : i32
    %36 = arith.index_cast %c2_i32 : i32 to index
    %c0_24 = arith.constant 0 : index
    %c0_25 = arith.constant 0 : index
    %37 = vector.load %arg0[%36, %c0_24, %c0_25] : memref<8x2x16xf32, #tpu.memory_space<vmem>>, vector<1x2x16xf32>
    %38 = vector.shape_cast %37 : vector<1x2x16xf32> to vector<2x16xf32>
    %c0_26 = arith.constant 0 : index
    %c0_27 = arith.constant 0 : index
    %39 = vector.load %arg1[%c0_26, %c0_27] : memref<1x16xf32, #tpu.memory_space<vmem>>, vector<1x16xf32>
    %40 = vector.broadcast %39 : vector<1x16xf32> to vector<2x16xf32>
    %41 = arith.subf %38, %40 : vector<2x16xf32>
    %c0_28 = arith.constant 0 : index
    %c0_29 = arith.constant 0 : index
    %42 = vector.load %arg2[%c0_28, %c0_29] : memref<1x16xf32, #tpu.memory_space<vmem>>, vector<1x16xf32>
    %43 = vector.broadcast %42 : vector<1x16xf32> to vector<2x16xf32>
    %44 = arith.mulf %41, %43 : vector<2x16xf32>
    %c0_30 = arith.constant 0 : index
    %c0_31 = arith.constant 0 : index
    %45 = vector.load %arg3[%c0_30, %c0_31] : memref<16x128xf32, #tpu.memory_space<vmem>>, vector<16x128xf32>
    %cst_32 = arith.constant dense<0.000000e+00> : vector<2x128xf32>
    %46 = tpu.matmul %44, %45, %cst_32 {dimension_numbers = #tpu.dot_dimension_numbers<[1], [0], [0], [1], [0, 0, 1, 1], [], []>} : vector<2x16xf32>, vector<16x128xf32>, vector<2x128xf32> -> vector<2x128xf32>
    %c0_33 = arith.constant 0 : index
    %c0_34 = arith.constant 0 : index
    %47 = vector.load %arg5[%c0_33, %c0_34] : memref<1x128xf32, #tpu.memory_space<vmem>>, vector<1x128xf32>
    %48 = vector.broadcast %47 : vector<1x128xf32> to vector<2x128xf32>
    %49 = arith.addf %46, %48 : vector<2x128xf32>
    %50 = arith.index_cast %c2_i32 : i32 to index
    %c0_35 = arith.constant 0 : index
    %c0_36 = arith.constant 0 : index
    %51 = vector.load %arg13[%50, %c0_35, %c0_36] : memref<8x2x128xf32, #tpu.memory_space<vmem>>, vector<1x2x128xf32>
    %52 = vector.shape_cast %51 : vector<1x2x128xf32> to vector<2x128xf32>
    %53 = vector.shape_cast %49 : vector<2x128xf32> to vector<1x2x128xf32>
    tpu.vector_store %arg13[%50, %c0_35, %c0_36], %53 {strides = array<i32>} : memref<8x2x128xf32, #tpu.memory_space<vmem>>, vector<1x2x128xf32>,
    %c3_i32 = arith.constant 3 : i32
    %54 = arith.index_cast %c3_i32 : i32 to index
    %c0_37 = arith.constant 0 : index
    %c0_38 = arith.constant 0 : index
    %55 = vector.load %arg0[%54, %c0_37, %c0_38] : memref<8x2x16xf32, #tpu.memory_space<vmem>>, vector<1x2x16xf32>
    %56 = vector.shape_cast %55 : vector<1x2x16xf32> to vector<2x16xf32>
    %c0_39 = arith.constant 0 : index
    %c0_40 = arith.constant 0 : index
    %57 = vector.load %arg1[%c0_39, %c0_40] : memref<1x16xf32, #tpu.memory_space<vmem>>, vector<1x16xf32>
    %58 = vector.broadcast %57 : vector<1x16xf32> to vector<2x16xf32>
    %59 = arith.subf %56, %58 : vector<2x16xf32>
    %c0_41 = arith.constant 0 : index
    %c0_42 = arith.constant 0 : index
    %60 = vector.load %arg2[%c0_41, %c0_42] : memref<1x16xf32, #tpu.memory_space<vmem>>, vector<1x16xf32>
    %61 = vector.broadcast %60 : vector<1x16xf32> to vector<2x16xf32>
    %62 = arith.mulf %59, %61 : vector<2x16xf32>
    %c0_43 = arith.constant 0 : index
    %c0_44 = arith.constant 0 : index
    %63 = vector.load %arg3[%c0_43, %c0_44] : memref<16x128xf32, #tpu.memory_space<vmem>>, vector<16x128xf32>
    %cst_45 = arith.constant dense<0.000000e+00> : vector<2x128xf32>
    %64 = tpu.matmul %62, %63, %cst_45 {dimension_numbers = #tpu.dot_dimension_numbers<[1], [0], [0], [1], [0, 0, 1, 1], [], []>} : vector<2x16xf32>, vector<16x128xf32>, vector<2x128xf32> -> vector<2x128xf32>
    %c0_46 = arith.constant 0 : index
    %c0_47 = arith.constant 0 : index
    %65 = vector.load %arg5[%c0_46, %c0_47] : memref<1x128xf32, #tpu.memory_space<vmem>>, vector<1x128xf32>
    %66 = vector.broadcast %65 : vector<1x128xf32> to vector<2x128xf32>
    %67 = arith.addf %64, %66 : vector<2x128xf32>
    %68 = arith.index_cast %c3_i32 : i32 to index
    %c0_48 = arith.constant 0 : index
    %c0_49 = arith.constant 0 : index
    %69 = vector.load %arg13[%68, %c0_48, %c0_49] : memref<8x2x128xf32, #tpu.memory_space<vmem>>, vector<1x2x128xf32>
    %70 = vector.shape_cast %69 : vector<1x2x128xf32> to vector<2x128xf32>
    %71 = vector.shape_cast %67 : vector<2x128xf32> to vector<1x2x128xf32>
    tpu.vector_store %arg13[%68, %c0_48, %c0_49], %71 {strides = array<i32>} : memref<8x2x128xf32, #tpu.memory_space<vmem>>, vector<1x2x128xf32>,
    %c4_i32 = arith.constant 4 : i32
    %72 = arith.index_cast %c4_i32 : i32 to index
    %c0_50 = arith.constant 0 : index
    %c0_51 = arith.constant 0 : index
    %73 = vector.load %arg0[%72, %c0_50, %c0_51] : memref<8x2x16xf32, #tpu.memory_space<vmem>>, vector<1x2x16xf32>
    %74 = vector.shape_cast %73 : vector<1x2x16xf32> to vector<2x16xf32>
    %c0_52 = arith.constant 0 : index
    %c0_53 = arith.constant 0 : index
    %75 = vector.load %arg1[%c0_52, %c0_53] : memref<1x16xf32, #tpu.memory_space<vmem>>, vector<1x16xf32>
    %76 = vector.broadcast %75 : vector<1x16xf32> to vector<2x16xf32>
    %77 = arith.subf %74, %76 : vector<2x16xf32>
    %c0_54 = arith.constant 0 : index
    %c0_55 = arith.constant 0 : index
    %78 = vector.load %arg2[%c0_54, %c0_55] : memref<1x16xf32, #tpu.memory_space<vmem>>, vector<1x16xf32>
    %79 = vector.broadcast %78 : vector<1x16xf32> to vector<2x16xf32>
    %80 = arith.mulf %77, %79 : vector<2x16xf32>
    %c0_56 = arith.constant 0 : index
    %c0_57 = arith.constant 0 : index
    %81 = vector.load %arg3[%c0_56, %c0_57] : memref<16x128xf32, #tpu.memory_space<vmem>>, vector<16x128xf32>
    %cst_58 = arith.constant dense<0.000000e+00> : vector<2x128xf32>
    %82 = tpu.matmul %80, %81, %cst_58 {dimension_numbers = #tpu.dot_dimension_numbers<[1], [0], [0], [1], [0, 0, 1, 1], [], []>} : vector<2x16xf32>, vector<16x128xf32>, vector<2x128xf32> -> vector<2x128xf32>
    %c0_59 = arith.constant 0 : index
    %c0_60 = arith.constant 0 : index
    %83 = vector.load %arg5[%c0_59, %c0_60] : memref<1x128xf32, #tpu.memory_space<vmem>>, vector<1x128xf32>
    %84 = vector.broadcast %83 : vector<1x128xf32> to vector<2x128xf32>
    %85 = arith.addf %82, %84 : vector<2x128xf32>
    %86 = arith.index_cast %c4_i32 : i32 to index
    %c0_61 = arith.constant 0 : index
    %c0_62 = arith.constant 0 : index
    %87 = vector.load %arg13[%86, %c0_61, %c0_62] : memref<8x2x128xf32, #tpu.memory_space<vmem>>, vector<1x2x128xf32>
    %88 = vector.shape_cast %87 : vector<1x2x128xf32> to vector<2x128xf32>
    %89 = vector.shape_cast %85 : vector<2x128xf32> to vector<1x2x128xf32>
    tpu.vector_store %arg13[%86, %c0_61, %c0_62], %89 {strides = array<i32>} : memref<8x2x128xf32, #tpu.memory_space<vmem>>, vector<1x2x128xf32>,
    %c5_i32 = arith.constant 5 : i32
    %90 = arith.index_cast %c5_i32 : i32 to index
    %c0_63 = arith.constant 0 : index
    %c0_64 = arith.constant 0 : index
    %91 = vector.load %arg0[%90, %c0_63, %c0_64] : memref<8x2x16xf32, #tpu.memory_space<vmem>>, vector<1x2x16xf32>
    %92 = vector.shape_cast %91 : vector<1x2x16xf32> to vector<2x16xf32>
    %c0_65 = arith.constant 0 : index
    %c0_66 = arith.constant 0 : index
    %93 = vector.load %arg1[%c0_65, %c0_66] : memref<1x16xf32, #tpu.memory_space<vmem>>, vector<1x16xf32>
    %94 = vector.broadcast %93 : vector<1x16xf32> to vector<2x16xf32>
    %95 = arith.subf %92, %94 : vector<2x16xf32>
    %c0_67 = arith.constant 0 : index
    %c0_68 = arith.constant 0 : index
    %96 = vector.load %arg2[%c0_67, %c0_68] : memref<1x16xf32, #tpu.memory_space<vmem>>, vector<1x16xf32>
    %97 = vector.broadcast %96 : vector<1x16xf32> to vector<2x16xf32>
    %98 = arith.mulf %95, %97 : vector<2x16xf32>
    %c0_69 = arith.constant 0 : index
    %c0_70 = arith.constant 0 : index
    %99 = vector.load %arg3[%c0_69, %c0_70] : memref<16x128xf32, #tpu.memory_space<vmem>>, vector<16x128xf32>
    %cst_71 = arith.constant dense<0.000000e+00> : vector<2x128xf32>
    %100 = tpu.matmul %98, %99, %cst_71 {dimension_numbers = #tpu.dot_dimension_numbers<[1], [0], [0], [1], [0, 0, 1, 1], [], []>} : vector<2x16xf32>, vector<16x128xf32>, vector<2x128xf32> -> vector<2x128xf32>
    %c0_72 = arith.constant 0 : index
    %c0_73 = arith.constant 0 : index
    %101 = vector.load %arg5[%c0_72, %c0_73] : memref<1x128xf32, #tpu.memory_space<vmem>>, vector<1x128xf32>
    %102 = vector.broadcast %101 : vector<1x128xf32> to vector<2x128xf32>
    %103 = arith.addf %100, %102 : vector<2x128xf32>
    %104 = arith.index_cast %c5_i32 : i32 to index
    %c0_74 = arith.constant 0 : index
    %c0_75 = arith.constant 0 : index
    %105 = vector.load %arg13[%104, %c0_74, %c0_75] : memref<8x2x128xf32, #tpu.memory_space<vmem>>, vector<1x2x128xf32>
    %106 = vector.shape_cast %105 : vector<1x2x128xf32> to vector<2x128xf32>
    %107 = vector.shape_cast %103 : vector<2x128xf32> to vector<1x2x128xf32>
    tpu.vector_store %arg13[%104, %c0_74, %c0_75], %107 {strides = array<i32>} : memref<8x2x128xf32, #tpu.memory_space<vmem>>, vector<1x2x128xf32>,
    %c6_i32 = arith.constant 6 : i32
    %108 = arith.index_cast %c6_i32 : i32 to index
    %c0_76 = arith.constant 0 : index
    %c0_77 = arith.constant 0 : index
    %109 = vector.load %arg0[%108, %c0_76, %c0_77] : memref<8x2x16xf32, #tpu.memory_space<vmem>>, vector<1x2x16xf32>
    %110 = vector.shape_cast %109 : vector<1x2x16xf32> to vector<2x16xf32>
    %c0_78 = arith.constant 0 : index
    %c0_79 = arith.constant 0 : index
    %111 = vector.load %arg1[%c0_78, %c0_79] : memref<1x16xf32, #tpu.memory_space<vmem>>, vector<1x16xf32>
    %112 = vector.broadcast %111 : vector<1x16xf32> to vector<2x16xf32>
    %113 = arith.subf %110, %112 : vector<2x16xf32>
    %c0_80 = arith.constant 0 : index
    %c0_81 = arith.constant 0 : index
    %114 = vector.load %arg2[%c0_80, %c0_81] : memref<1x16xf32, #tpu.memory_space<vmem>>, vector<1x16xf32>
    %115 = vector.broadcast %114 : vector<1x16xf32> to vector<2x16xf32>
    %116 = arith.mulf %113, %115 : vector<2x16xf32>
    %c0_82 = arith.constant 0 : index
    %c0_83 = arith.constant 0 : index
    %117 = vector.load %arg3[%c0_82, %c0_83] : memref<16x128xf32, #tpu.memory_space<vmem>>, vector<16x128xf32>
    %cst_84 = arith.constant dense<0.000000e+00> : vector<2x128xf32>
    %118 = tpu.matmul %116, %117, %cst_84 {dimension_numbers = #tpu.dot_dimension_numbers<[1], [0], [0], [1], [0, 0, 1, 1], [], []>} : vector<2x16xf32>, vector<16x128xf32>, vector<2x128xf32> -> vector<2x128xf32>
    %c0_85 = arith.constant 0 : index
    %c0_86 = arith.constant 0 : index
    %119 = vector.load %arg5[%c0_85, %c0_86] : memref<1x128xf32, #tpu.memory_space<vmem>>, vector<1x128xf32>
    %120 = vector.broadcast %119 : vector<1x128xf32> to vector<2x128xf32>
    %121 = arith.addf %118, %120 : vector<2x128xf32>
    %122 = arith.index_cast %c6_i32 : i32 to index
    %c0_87 = arith.constant 0 : index
    %c0_88 = arith.constant 0 : index
    %123 = vector.load %arg13[%122, %c0_87, %c0_88] : memref<8x2x128xf32, #tpu.memory_space<vmem>>, vector<1x2x128xf32>
    %124 = vector.shape_cast %123 : vector<1x2x128xf32> to vector<2x128xf32>
    %125 = vector.shape_cast %121 : vector<2x128xf32> to vector<1x2x128xf32>
    tpu.vector_store %arg13[%122, %c0_87, %c0_88], %125 {strides = array<i32>} : memref<8x2x128xf32, #tpu.memory_space<vmem>>, vector<1x2x128xf32>,
    %c7_i32 = arith.constant 7 : i32
    %126 = arith.index_cast %c7_i32 : i32 to index
    %c0_89 = arith.constant 0 : index
    %c0_90 = arith.constant 0 : index
    %127 = vector.load %arg0[%126, %c0_89, %c0_90] : memref<8x2x16xf32, #tpu.memory_space<vmem>>, vector<1x2x16xf32>
    %128 = vector.shape_cast %127 : vector<1x2x16xf32> to vector<2x16xf32>
    %c0_91 = arith.constant 0 : index
    %c0_92 = arith.constant 0 : index
    %129 = vector.load %arg1[%c0_91, %c0_92] : memref<1x16xf32, #tpu.memory_space<vmem>>, vector<1x16xf32>
    %130 = vector.broadcast %129 : vector<1x16xf32> to vector<2x16xf32>
    %131 = arith.subf %128, %130 : vector<2x16xf32>
    %c0_93 = arith.constant 0 : index
    %c0_94 = arith.constant 0 : index
    %132 = vector.load %arg2[%c0_93, %c0_94] : memref<1x16xf32, #tpu.memory_space<vmem>>, vector<1x16xf32>
    %133 = vector.broadcast %132 : vector<1x16xf32> to vector<2x16xf32>
    %134 = arith.mulf %131, %133 : vector<2x16xf32>
    %c0_95 = arith.constant 0 : index
    %c0_96 = arith.constant 0 : index
    %135 = vector.load %arg3[%c0_95, %c0_96] : memref<16x128xf32, #tpu.memory_space<vmem>>, vector<16x128xf32>
    %cst_97 = arith.constant dense<0.000000e+00> : vector<2x128xf32>
    %136 = tpu.matmul %134, %135, %cst_97 {dimension_numbers = #tpu.dot_dimension_numbers<[1], [0], [0], [1], [0, 0, 1, 1], [], []>} : vector<2x16xf32>, vector<16x128xf32>, vector<2x128xf32> -> vector<2x128xf32>
    %c0_98 = arith.constant 0 : index
    %c0_99 = arith.constant 0 : index
    %137 = vector.load %arg5[%c0_98, %c0_99] : memref<1x128xf32, #tpu.memory_space<vmem>>, vector<1x128xf32>
    %138 = vector.broadcast %137 : vector<1x128xf32> to vector<2x128xf32>
    %139 = arith.addf %136, %138 : vector<2x128xf32>
    %140 = arith.index_cast %c7_i32 : i32 to index
    %c0_100 = arith.constant 0 : index
    %c0_101 = arith.constant 0 : index
    %141 = vector.load %arg13[%140, %c0_100, %c0_101] : memref<8x2x128xf32, #tpu.memory_space<vmem>>, vector<1x2x128xf32>
    %142 = vector.shape_cast %141 : vector<1x2x128xf32> to vector<2x128xf32>
    %143 = vector.shape_cast %139 : vector<2x128xf32> to vector<1x2x128xf32>
    tpu.vector_store %arg13[%140, %c0_100, %c0_101], %143 {strides = array<i32>} : memref<8x2x128xf32, #tpu.memory_space<vmem>>, vector<1x2x128xf32>,
    %c8_i32 = arith.constant 8 : i32
    %cst_102 = arith.constant 0.000000e+00 : f32
    %144 = vector.broadcast %cst_102 : f32 to vector<2x32xf32>
    %cst_103 = arith.constant 0.000000e+00 : f32
    %145 = vector.broadcast %cst_103 : f32 to vector<2x32xf32>
    %c0_i32_104 = arith.constant 0 : i32
    %146 = arith.index_cast %c0_i32_104 : i32 to index
    %c0_105 = arith.constant 0 : index
    %c0_106 = arith.constant 0 : index
    %147 = vector.load %arg13[%146, %c0_105, %c0_106] : memref<8x2x128xf32, #tpu.memory_space<vmem>>, vector<1x2x128xf32>
    %148 = vector.shape_cast %147 : vector<1x2x128xf32> to vector<2x128xf32>
    %c0_107 = arith.constant 0 : index
    %c0_108 = arith.constant 0 : index
    %149 = vector.load %arg4[%c0_107, %c0_108] : memref<32x128xf32, #tpu.memory_space<vmem>>, vector<32x128xf32>
    %cst_109 = arith.constant dense<0.000000e+00> : vector<2x128xf32>
    %150 = tpu.matmul %144, %149, %cst_109 {dimension_numbers = #tpu.dot_dimension_numbers<[1], [0], [0], [1], [0, 0, 1, 1], [], []>} : vector<2x32xf32>, vector<32x128xf32>, vector<2x128xf32> -> vector<2x128xf32>
    %151 = arith.addf %148, %150 : vector<2x128xf32>
    %152 = arith.negf %151 : vector<2x128xf32>
    %153 = math.exp %152 : vector<2x128xf32>
    %cst_110 = arith.constant 1.000000e+00 : f32
    %154 = vector.broadcast %cst_110 : f32 to vector<2x128xf32>
    %155 = arith.addf %154, %153 : vector<2x128xf32>
    %156 = arith.divf %154, %155 : vector<2x128xf32>
    %157 = math.tanh %151 : vector<2x128xf32>
    %158 = vector.extract_strided_slice %156 {offsets = [0, 0], sizes = [2, 32], strides = [1, 1]} : vector<2x128xf32> to vector<2x32xf32>
    %159 = vector.extract_strided_slice %156 {offsets = [0, 32], sizes = [2, 32], strides = [1, 1]} : vector<2x128xf32> to vector<2x32xf32>
    %160 = vector.extract_strided_slice %157 {offsets = [0, 64], sizes = [2, 32], strides = [1, 1]} : vector<2x128xf32> to vector<2x32xf32>
    %161 = vector.extract_strided_slice %156 {offsets = [0, 96], sizes = [2, 32], strides = [1, 1]} : vector<2x128xf32> to vector<2x32xf32>
    %162 = arith.mulf %159, %145 : vector<2x32xf32>
    %163 = arith.mulf %158, %160 : vector<2x32xf32>
    %164 = arith.addf %162, %163 : vector<2x32xf32>
    %165 = math.tanh %164 : vector<2x32xf32>
    %166 = arith.mulf %161, %165 : vector<2x32xf32>
    %167 = arith.index_cast %c0_i32_104 : i32 to index
    %c0_111 = arith.constant 0 : index
    %c0_112 = arith.constant 0 : index
    %168 = vector.load %arg12[%167, %c0_111, %c0_112] : memref<8x2x32xf32, #tpu.memory_space<vmem>>, vector<1x2x32xf32>
    %169 = vector.shape_cast %168 : vector<1x2x32xf32> to vector<2x32xf32>
    %170 = vector.shape_cast %166 : vector<2x32xf32> to vector<1x2x32xf32>
    tpu.vector_store %arg12[%167, %c0_111, %c0_112], %170 {strides = array<i32>} : memref<8x2x32xf32, #tpu.memory_space<vmem>>, vector<1x2x32xf32>,
    %c1_i32_113 = arith.constant 1 : i32
    %171 = arith.index_cast %c1_i32_113 : i32 to index
    %c0_114 = arith.constant 0 : index
    %c0_115 = arith.constant 0 : index
    %172 = vector.load %arg13[%171, %c0_114, %c0_115] : memref<8x2x128xf32, #tpu.memory_space<vmem>>, vector<1x2x128xf32>
    %173 = vector.shape_cast %172 : vector<1x2x128xf32> to vector<2x128xf32>
    %c0_116 = arith.constant 0 : index
    %c0_117 = arith.constant 0 : index
    %174 = vector.load %arg4[%c0_116, %c0_117] : memref<32x128xf32, #tpu.memory_space<vmem>>, vector<32x128xf32>
    %cst_118 = arith.constant dense<0.000000e+00> : vector<2x128xf32>
    %175 = tpu.matmul %166, %174, %cst_118 {dimension_numbers = #tpu.dot_dimension_numbers<[1], [0], [0], [1], [0, 0, 1, 1], [], []>} : vector<2x32xf32>, vector<32x128xf32>, vector<2x128xf32> -> vector<2x128xf32>
    %176 = arith.addf %173, %175 : vector<2x128xf32>
    %177 = arith.negf %176 : vector<2x128xf32>
    %178 = math.exp %177 : vector<2x128xf32>
    %cst_119 = arith.constant 1.000000e+00 : f32
    %179 = vector.broadcast %cst_119 : f32 to vector<2x128xf32>
    %180 = arith.addf %179, %178 : vector<2x128xf32>
    %181 = arith.divf %179, %180 : vector<2x128xf32>
    %182 = math.tanh %176 : vector<2x128xf32>
    %183 = vector.extract_strided_slice %181 {offsets = [0, 0], sizes = [2, 32], strides = [1, 1]} : vector<2x128xf32> to vector<2x32xf32>
    %184 = vector.extract_strided_slice %181 {offsets = [0, 32], sizes = [2, 32], strides = [1, 1]} : vector<2x128xf32> to vector<2x32xf32>
    %185 = vector.extract_strided_slice %182 {offsets = [0, 64], sizes = [2, 32], strides = [1, 1]} : vector<2x128xf32> to vector<2x32xf32>
    %186 = vector.extract_strided_slice %181 {offsets = [0, 96], sizes = [2, 32], strides = [1, 1]} : vector<2x128xf32> to vector<2x32xf32>
    %187 = arith.mulf %184, %164 : vector<2x32xf32>
    %188 = arith.mulf %183, %185 : vector<2x32xf32>
    %189 = arith.addf %187, %188 : vector<2x32xf32>
    %190 = math.tanh %189 : vector<2x32xf32>
    %191 = arith.mulf %186, %190 : vector<2x32xf32>
    %192 = arith.index_cast %c1_i32_113 : i32 to index
    %c0_120 = arith.constant 0 : index
    %c0_121 = arith.constant 0 : index
    %193 = vector.load %arg12[%192, %c0_120, %c0_121] : memref<8x2x32xf32, #tpu.memory_space<vmem>>, vector<1x2x32xf32>
    %194 = vector.shape_cast %193 : vector<1x2x32xf32> to vector<2x32xf32>
    %195 = vector.shape_cast %191 : vector<2x32xf32> to vector<1x2x32xf32>
    tpu.vector_store %arg12[%192, %c0_120, %c0_121], %195 {strides = array<i32>} : memref<8x2x32xf32, #tpu.memory_space<vmem>>, vector<1x2x32xf32>,
    %c2_i32_122 = arith.constant 2 : i32
    %196 = arith.index_cast %c2_i32_122 : i32 to index
    %c0_123 = arith.constant 0 : index
    %c0_124 = arith.constant 0 : index
    %197 = vector.load %arg13[%196, %c0_123, %c0_124] : memref<8x2x128xf32, #tpu.memory_space<vmem>>, vector<1x2x128xf32>
    %198 = vector.shape_cast %197 : vector<1x2x128xf32> to vector<2x128xf32>
    %c0_125 = arith.constant 0 : index
    %c0_126 = arith.constant 0 : index
    %199 = vector.load %arg4[%c0_125, %c0_126] : memref<32x128xf32, #tpu.memory_space<vmem>>, vector<32x128xf32>
    %cst_127 = arith.constant dense<0.000000e+00> : vector<2x128xf32>
    %200 = tpu.matmul %191, %199, %cst_127 {dimension_numbers = #tpu.dot_dimension_numbers<[1], [0], [0], [1], [0, 0, 1, 1], [], []>} : vector<2x32xf32>, vector<32x128xf32>, vector<2x128xf32> -> vector<2x128xf32>
    %201 = arith.addf %198, %200 : vector<2x128xf32>
    %202 = arith.negf %201 : vector<2x128xf32>
    %203 = math.exp %202 : vector<2x128xf32>
    %cst_128 = arith.constant 1.000000e+00 : f32
    %204 = vector.broadcast %cst_128 : f32 to vector<2x128xf32>
    %205 = arith.addf %204, %203 : vector<2x128xf32>
    %206 = arith.divf %204, %205 : vector<2x128xf32>
    %207 = math.tanh %201 : vector<2x128xf32>
    %208 = vector.extract_strided_slice %206 {offsets = [0, 0], sizes = [2, 32], strides = [1, 1]} : vector<2x128xf32> to vector<2x32xf32>
    %209 = vector.extract_strided_slice %206 {offsets = [0, 32], sizes = [2, 32], strides = [1, 1]} : vector<2x128xf32> to vector<2x32xf32>
    %210 = vector.extract_strided_slice %207 {offsets = [0, 64], sizes = [2, 32], strides = [1, 1]} : vector<2x128xf32> to vector<2x32xf32>
    %211 = vector.extract_strided_slice %206 {offsets = [0, 96], sizes = [2, 32], strides = [1, 1]} : vector<2x128xf32> to vector<2x32xf32>
    %212 = arith.mulf %209, %189 : vector<2x32xf32>
    %213 = arith.mulf %208, %210 : vector<2x32xf32>
    %214 = arith.addf %212, %213 : vector<2x32xf32>
    %215 = math.tanh %214 : vector<2x32xf32>
    %216 = arith.mulf %211, %215 : vector<2x32xf32>
    %217 = arith.index_cast %c2_i32_122 : i32 to index
    %c0_129 = arith.constant 0 : index
    %c0_130 = arith.constant 0 : index
    %218 = vector.load %arg12[%217, %c0_129, %c0_130] : memref<8x2x32xf32, #tpu.memory_space<vmem>>, vector<1x2x32xf32>
    %219 = vector.shape_cast %218 : vector<1x2x32xf32> to vector<2x32xf32>
    %220 = vector.shape_cast %216 : vector<2x32xf32> to vector<1x2x32xf32>
    tpu.vector_store %arg12[%217, %c0_129, %c0_130], %220 {strides = array<i32>} : memref<8x2x32xf32, #tpu.memory_space<vmem>>, vector<1x2x32xf32>,
    %c3_i32_131 = arith.constant 3 : i32
    %221 = arith.index_cast %c3_i32_131 : i32 to index
    %c0_132 = arith.constant 0 : index
    %c0_133 = arith.constant 0 : index
    %222 = vector.load %arg13[%221, %c0_132, %c0_133] : memref<8x2x128xf32, #tpu.memory_space<vmem>>, vector<1x2x128xf32>
    %223 = vector.shape_cast %222 : vector<1x2x128xf32> to vector<2x128xf32>
    %c0_134 = arith.constant 0 : index
    %c0_135 = arith.constant 0 : index
    %224 = vector.load %arg4[%c0_134, %c0_135] : memref<32x128xf32, #tpu.memory_space<vmem>>, vector<32x128xf32>
    %cst_136 = arith.constant dense<0.000000e+00> : vector<2x128xf32>
    %225 = tpu.matmul %216, %224, %cst_136 {dimension_numbers = #tpu.dot_dimension_numbers<[1], [0], [0], [1], [0, 0, 1, 1], [], []>} : vector<2x32xf32>, vector<32x128xf32>, vector<2x128xf32> -> vector<2x128xf32>
    %226 = arith.addf %223, %225 : vector<2x128xf32>
    %227 = arith.negf %226 : vector<2x128xf32>
    %228 = math.exp %227 : vector<2x128xf32>
    %cst_137 = arith.constant 1.000000e+00 : f32
    %229 = vector.broadcast %cst_137 : f32 to vector<2x128xf32>
    %230 = arith.addf %229, %228 : vector<2x128xf32>
    %231 = arith.divf %229, %230 : vector<2x128xf32>
    %232 = math.tanh %226 : vector<2x128xf32>
    %233 = vector.extract_strided_slice %231 {offsets = [0, 0], sizes = [2, 32], strides = [1, 1]} : vector<2x128xf32> to vector<2x32xf32>
    %234 = vector.extract_strided_slice %231 {offsets = [0, 32], sizes = [2, 32], strides = [1, 1]} : vector<2x128xf32> to vector<2x32xf32>
    %235 = vector.extract_strided_slice %232 {offsets = [0, 64], sizes = [2, 32], strides = [1, 1]} : vector<2x128xf32> to vector<2x32xf32>
    %236 = vector.extract_strided_slice %231 {offsets = [0, 96], sizes = [2, 32], strides = [1, 1]} : vector<2x128xf32> to vector<2x32xf32>
    %237 = arith.mulf %234, %214 : vector<2x32xf32>
    %238 = arith.mulf %233, %235 : vector<2x32xf32>
    %239 = arith.addf %237, %238 : vector<2x32xf32>
    %240 = math.tanh %239 : vector<2x32xf32>
    %241 = arith.mulf %236, %240 : vector<2x32xf32>
    %242 = arith.index_cast %c3_i32_131 : i32 to index
    %c0_138 = arith.constant 0 : index
    %c0_139 = arith.constant 0 : index
    %243 = vector.load %arg12[%242, %c0_138, %c0_139] : memref<8x2x32xf32, #tpu.memory_space<vmem>>, vector<1x2x32xf32>
    %244 = vector.shape_cast %243 : vector<1x2x32xf32> to vector<2x32xf32>
    %245 = vector.shape_cast %241 : vector<2x32xf32> to vector<1x2x32xf32>
    tpu.vector_store %arg12[%242, %c0_138, %c0_139], %245 {strides = array<i32>} : memref<8x2x32xf32, #tpu.memory_space<vmem>>, vector<1x2x32xf32>,
    %c4_i32_140 = arith.constant 4 : i32
    %246 = arith.index_cast %c4_i32_140 : i32 to index
    %c0_141 = arith.constant 0 : index
    %c0_142 = arith.constant 0 : index
    %247 = vector.load %arg13[%246, %c0_141, %c0_142] : memref<8x2x128xf32, #tpu.memory_space<vmem>>, vector<1x2x128xf32>
    %248 = vector.shape_cast %247 : vector<1x2x128xf32> to vector<2x128xf32>
    %c0_143 = arith.constant 0 : index
    %c0_144 = arith.constant 0 : index
    %249 = vector.load %arg4[%c0_143, %c0_144] : memref<32x128xf32, #tpu.memory_space<vmem>>, vector<32x128xf32>
    %cst_145 = arith.constant dense<0.000000e+00> : vector<2x128xf32>
    %250 = tpu.matmul %241, %249, %cst_145 {dimension_numbers = #tpu.dot_dimension_numbers<[1], [0], [0], [1], [0, 0, 1, 1], [], []>} : vector<2x32xf32>, vector<32x128xf32>, vector<2x128xf32> -> vector<2x128xf32>
    %251 = arith.addf %248, %250 : vector<2x128xf32>
    %252 = arith.negf %251 : vector<2x128xf32>
    %253 = math.exp %252 : vector<2x128xf32>
    %cst_146 = arith.constant 1.000000e+00 : f32
    %254 = vector.broadcast %cst_146 : f32 to vector<2x128xf32>
    %255 = arith.addf %254, %253 : vector<2x128xf32>
    %256 = arith.divf %254, %255 : vector<2x128xf32>
    %257 = math.tanh %251 : vector<2x128xf32>
    %258 = vector.extract_strided_slice %256 {offsets = [0, 0], sizes = [2, 32], strides = [1, 1]} : vector<2x128xf32> to vector<2x32xf32>
    %259 = vector.extract_strided_slice %256 {offsets = [0, 32], sizes = [2, 32], strides = [1, 1]} : vector<2x128xf32> to vector<2x32xf32>
    %260 = vector.extract_strided_slice %257 {offsets = [0, 64], sizes = [2, 32], strides = [1, 1]} : vector<2x128xf32> to vector<2x32xf32>
    %261 = vector.extract_strided_slice %256 {offsets = [0, 96], sizes = [2, 32], strides = [1, 1]} : vector<2x128xf32> to vector<2x32xf32>
    %262 = arith.mulf %259, %239 : vector<2x32xf32>
    %263 = arith.mulf %258, %260 : vector<2x32xf32>
    %264 = arith.addf %262, %263 : vector<2x32xf32>
    %265 = math.tanh %264 : vector<2x32xf32>
    %266 = arith.mulf %261, %265 : vector<2x32xf32>
    %267 = arith.index_cast %c4_i32_140 : i32 to index
    %c0_147 = arith.constant 0 : index
    %c0_148 = arith.constant 0 : index
    %268 = vector.load %arg12[%267, %c0_147, %c0_148] : memref<8x2x32xf32, #tpu.memory_space<vmem>>, vector<1x2x32xf32>
    %269 = vector.shape_cast %268 : vector<1x2x32xf32> to vector<2x32xf32>
    %270 = vector.shape_cast %266 : vector<2x32xf32> to vector<1x2x32xf32>
    tpu.vector_store %arg12[%267, %c0_147, %c0_148], %270 {strides = array<i32>} : memref<8x2x32xf32, #tpu.memory_space<vmem>>, vector<1x2x32xf32>,
    %c5_i32_149 = arith.constant 5 : i32
    %271 = arith.index_cast %c5_i32_149 : i32 to index
    %c0_150 = arith.constant 0 : index
    %c0_151 = arith.constant 0 : index
    %272 = vector.load %arg13[%271, %c0_150, %c0_151] : memref<8x2x128xf32, #tpu.memory_space<vmem>>, vector<1x2x128xf32>
    %273 = vector.shape_cast %272 : vector<1x2x128xf32> to vector<2x128xf32>
    %c0_152 = arith.constant 0 : index
    %c0_153 = arith.constant 0 : index
    %274 = vector.load %arg4[%c0_152, %c0_153] : memref<32x128xf32, #tpu.memory_space<vmem>>, vector<32x128xf32>
    %cst_154 = arith.constant dense<0.000000e+00> : vector<2x128xf32>
    %275 = tpu.matmul %266, %274, %cst_154 {dimension_numbers = #tpu.dot_dimension_numbers<[1], [0], [0], [1], [0, 0, 1, 1], [], []>} : vector<2x32xf32>, vector<32x128xf32>, vector<2x128xf32> -> vector<2x128xf32>
    %276 = arith.addf %273, %275 : vector<2x128xf32>
    %277 = arith.negf %276 : vector<2x128xf32>
    %278 = math.exp %277 : vector<2x128xf32>
    %cst_155 = arith.constant 1.000000e+00 : f32
    %279 = vector.broadcast %cst_155 : f32 to vector<2x128xf32>
    %280 = arith.addf %279, %278 : vector<2x128xf32>
    %281 = arith.divf %279, %280 : vector<2x128xf32>
    %282 = math.tanh %276 : vector<2x128xf32>
    %283 = vector.extract_strided_slice %281 {offsets = [0, 0], sizes = [2, 32], strides = [1, 1]} : vector<2x128xf32> to vector<2x32xf32>
    %284 = vector.extract_strided_slice %281 {offsets = [0, 32], sizes = [2, 32], strides = [1, 1]} : vector<2x128xf32> to vector<2x32xf32>
    %285 = vector.extract_strided_slice %282 {offsets = [0, 64], sizes = [2, 32], strides = [1, 1]} : vector<2x128xf32> to vector<2x32xf32>
    %286 = vector.extract_strided_slice %281 {offsets = [0, 96], sizes = [2, 32], strides = [1, 1]} : vector<2x128xf32> to vector<2x32xf32>
    %287 = arith.mulf %284, %264 : vector<2x32xf32>
    %288 = arith.mulf %283, %285 : vector<2x32xf32>
    %289 = arith.addf %287, %288 : vector<2x32xf32>
    %290 = math.tanh %289 : vector<2x32xf32>
    %291 = arith.mulf %286, %290 : vector<2x32xf32>
    %292 = arith.index_cast %c5_i32_149 : i32 to index
    %c0_156 = arith.constant 0 : index
    %c0_157 = arith.constant 0 : index
    %293 = vector.load %arg12[%292, %c0_156, %c0_157] : memref<8x2x32xf32, #tpu.memory_space<vmem>>, vector<1x2x32xf32>
    %294 = vector.shape_cast %293 : vector<1x2x32xf32> to vector<2x32xf32>
    %295 = vector.shape_cast %291 : vector<2x32xf32> to vector<1x2x32xf32>
    tpu.vector_store %arg12[%292, %c0_156, %c0_157], %295 {strides = array<i32>} : memref<8x2x32xf32, #tpu.memory_space<vmem>>, vector<1x2x32xf32>,
    %c6_i32_158 = arith.constant 6 : i32
    %296 = arith.index_cast %c6_i32_158 : i32 to index
    %c0_159 = arith.constant 0 : index
    %c0_160 = arith.constant 0 : index
    %297 = vector.load %arg13[%296, %c0_159, %c0_160] : memref<8x2x128xf32, #tpu.memory_space<vmem>>, vector<1x2x128xf32>
    %298 = vector.shape_cast %297 : vector<1x2x128xf32> to vector<2x128xf32>
    %c0_161 = arith.constant 0 : index
    %c0_162 = arith.constant 0 : index
    %299 = vector.load %arg4[%c0_161, %c0_162] : memref<32x128xf32, #tpu.memory_space<vmem>>, vector<32x128xf32>
    %cst_163 = arith.constant dense<0.000000e+00> : vector<2x128xf32>
    %300 = tpu.matmul %291, %299, %cst_163 {dimension_numbers = #tpu.dot_dimension_numbers<[1], [0], [0], [1], [0, 0, 1, 1], [], []>} : vector<2x32xf32>, vector<32x128xf32>, vector<2x128xf32> -> vector<2x128xf32>
    %301 = arith.addf %298, %300 : vector<2x128xf32>
    %302 = arith.negf %301 : vector<2x128xf32>
    %303 = math.exp %302 : vector<2x128xf32>
    %cst_164 = arith.constant 1.000000e+00 : f32
    %304 = vector.broadcast %cst_164 : f32 to vector<2x128xf32>
    %305 = arith.addf %304, %303 : vector<2x128xf32>
    %306 = arith.divf %304, %305 : vector<2x128xf32>
    %307 = math.tanh %301 : vector<2x128xf32>
    %308 = vector.extract_strided_slice %306 {offsets = [0, 0], sizes = [2, 32], strides = [1, 1]} : vector<2x128xf32> to vector<2x32xf32>
    %309 = vector.extract_strided_slice %306 {offsets = [0, 32], sizes = [2, 32], strides = [1, 1]} : vector<2x128xf32> to vector<2x32xf32>
    %310 = vector.extract_strided_slice %307 {offsets = [0, 64], sizes = [2, 32], strides = [1, 1]} : vector<2x128xf32> to vector<2x32xf32>
    %311 = vector.extract_strided_slice %306 {offsets = [0, 96], sizes = [2, 32], strides = [1, 1]} : vector<2x128xf32> to vector<2x32xf32>
    %312 = arith.mulf %309, %289 : vector<2x32xf32>
    %313 = arith.mulf %308, %310 : vector<2x32xf32>
    %314 = arith.addf %312, %313 : vector<2x32xf32>
    %315 = math.tanh %314 : vector<2x32xf32>
    %316 = arith.mulf %311, %315 : vector<2x32xf32>
    %317 = arith.index_cast %c6_i32_158 : i32 to index
    %c0_165 = arith.constant 0 : index
    %c0_166 = arith.constant 0 : index
    %318 = vector.load %arg12[%317, %c0_165, %c0_166] : memref<8x2x32xf32, #tpu.memory_space<vmem>>, vector<1x2x32xf32>
    %319 = vector.shape_cast %318 : vector<1x2x32xf32> to vector<2x32xf32>
    %320 = vector.shape_cast %316 : vector<2x32xf32> to vector<1x2x32xf32>
    tpu.vector_store %arg12[%317, %c0_165, %c0_166], %320 {strides = array<i32>} : memref<8x2x32xf32, #tpu.memory_space<vmem>>, vector<1x2x32xf32>,
    %c7_i32_167 = arith.constant 7 : i32
    %321 = arith.index_cast %c7_i32_167 : i32 to index
    %c0_168 = arith.constant 0 : index
    %c0_169 = arith.constant 0 : index
    %322 = vector.load %arg13[%321, %c0_168, %c0_169] : memref<8x2x128xf32, #tpu.memory_space<vmem>>, vector<1x2x128xf32>
    %323 = vector.shape_cast %322 : vector<1x2x128xf32> to vector<2x128xf32>
    %c0_170 = arith.constant 0 : index
    %c0_171 = arith.constant 0 : index
    %324 = vector.load %arg4[%c0_170, %c0_171] : memref<32x128xf32, #tpu.memory_space<vmem>>, vector<32x128xf32>
    %cst_172 = arith.constant dense<0.000000e+00> : vector<2x128xf32>
    %325 = tpu.matmul %316, %324, %cst_172 {dimension_numbers = #tpu.dot_dimension_numbers<[1], [0], [0], [1], [0, 0, 1, 1], [], []>} : vector<2x32xf32>, vector<32x128xf32>, vector<2x128xf32> -> vector<2x128xf32>
    %326 = arith.addf %323, %325 : vector<2x128xf32>
    %327 = arith.negf %326 : vector<2x128xf32>
    %328 = math.exp %327 : vector<2x128xf32>
    %cst_173 = arith.constant 1.000000e+00 : f32
    %329 = vector.broadcast %cst_173 : f32 to vector<2x128xf32>
    %330 = arith.addf %329, %328 : vector<2x128xf32>
    %331 = arith.divf %329, %330 : vector<2x128xf32>
    %332 = math.tanh %326 : vector<2x128xf32>
    %333 = vector.extract_strided_slice %331 {offsets = [0, 0], sizes = [2, 32], strides = [1, 1]} : vector<2x128xf32> to vector<2x32xf32>
    %334 = vector.extract_strided_slice %331 {offsets = [0, 32], sizes = [2, 32], strides = [1, 1]} : vector<2x128xf32> to vector<2x32xf32>
    %335 = vector.extract_strided_slice %332 {offsets = [0, 64], sizes = [2, 32], strides = [1, 1]} : vector<2x128xf32> to vector<2x32xf32>
    %336 = vector.extract_strided_slice %331 {offsets = [0, 96], sizes = [2, 32], strides = [1, 1]} : vector<2x128xf32> to vector<2x32xf32>
    %337 = arith.mulf %334, %314 : vector<2x32xf32>
    %338 = arith.mulf %333, %335 : vector<2x32xf32>
    %339 = arith.addf %337, %338 : vector<2x32xf32>
    %340 = math.tanh %339 : vector<2x32xf32>
    %341 = arith.mulf %336, %340 : vector<2x32xf32>
    %342 = arith.index_cast %c7_i32_167 : i32 to index
    %c0_174 = arith.constant 0 : index
    %c0_175 = arith.constant 0 : index
    %343 = vector.load %arg12[%342, %c0_174, %c0_175] : memref<8x2x32xf32, #tpu.memory_space<vmem>>, vector<1x2x32xf32>
    %344 = vector.shape_cast %343 : vector<1x2x32xf32> to vector<2x32xf32>
    %345 = vector.shape_cast %341 : vector<2x32xf32> to vector<1x2x32xf32>
    tpu.vector_store %arg12[%342, %c0_174, %c0_175], %345 {strides = array<i32>} : memref<8x2x32xf32, #tpu.memory_space<vmem>>, vector<1x2x32xf32>,
    %c8_i32_176 = arith.constant 8 : i32
    %c0_i32_177 = arith.constant 0 : i32
    %346 = arith.index_cast %c0_i32_177 : i32 to index
    %c0_178 = arith.constant 0 : index
    %c0_179 = arith.constant 0 : index
    %347 = vector.load %arg12[%346, %c0_178, %c0_179] : memref<8x2x32xf32, #tpu.memory_space<vmem>>, vector<1x2x32xf32>
    %348 = vector.shape_cast %347 : vector<1x2x32xf32> to vector<2x32xf32>
    %c0_180 = arith.constant 0 : index
    %c0_181 = arith.constant 0 : index
    %349 = vector.load %arg6[%c0_180, %c0_181] : memref<32x128xf32, #tpu.memory_space<vmem>>, vector<32x128xf32>
    %cst_182 = arith.constant dense<0.000000e+00> : vector<2x128xf32>
    %350 = tpu.matmul %348, %349, %cst_182 {dimension_numbers = #tpu.dot_dimension_numbers<[1], [0], [0], [1], [0, 0, 1, 1], [], []>} : vector<2x32xf32>, vector<32x128xf32>, vector<2x128xf32> -> vector<2x128xf32>
    %c0_183 = arith.constant 0 : index
    %c0_184 = arith.constant 0 : index
    %351 = vector.load %arg8[%c0_183, %c0_184] : memref<1x128xf32, #tpu.memory_space<vmem>>, vector<1x128xf32>
    %352 = vector.broadcast %351 : vector<1x128xf32> to vector<2x128xf32>
    %353 = arith.addf %350, %352 : vector<2x128xf32>
    %354 = arith.index_cast %c0_i32_177 : i32 to index
    %c0_185 = arith.constant 0 : index
    %c0_186 = arith.constant 0 : index
    %355 = vector.load %arg13[%354, %c0_185, %c0_186] : memref<8x2x128xf32, #tpu.memory_space<vmem>>, vector<1x2x128xf32>
    %356 = vector.shape_cast %355 : vector<1x2x128xf32> to vector<2x128xf32>
    %357 = vector.shape_cast %353 : vector<2x128xf32> to vector<1x2x128xf32>
    tpu.vector_store %arg13[%354, %c0_185, %c0_186], %357 {strides = array<i32>} : memref<8x2x128xf32, #tpu.memory_space<vmem>>, vector<1x2x128xf32>,
    %c1_i32_187 = arith.constant 1 : i32
    %358 = arith.index_cast %c1_i32_187 : i32 to index
    %c0_188 = arith.constant 0 : index
    %c0_189 = arith.constant 0 : index
    %359 = vector.load %arg12[%358, %c0_188, %c0_189] : memref<8x2x32xf32, #tpu.memory_space<vmem>>, vector<1x2x32xf32>
    %360 = vector.shape_cast %359 : vector<1x2x32xf32> to vector<2x32xf32>
    %c0_190 = arith.constant 0 : index
    %c0_191 = arith.constant 0 : index
    %361 = vector.load %arg6[%c0_190, %c0_191] : memref<32x128xf32, #tpu.memory_space<vmem>>, vector<32x128xf32>
    %cst_192 = arith.constant dense<0.000000e+00> : vector<2x128xf32>
    %362 = tpu.matmul %360, %361, %cst_192 {dimension_numbers = #tpu.dot_dimension_numbers<[1], [0], [0], [1], [0, 0, 1, 1], [], []>} : vector<2x32xf32>, vector<32x128xf32>, vector<2x128xf32> -> vector<2x128xf32>
    %c0_193 = arith.constant 0 : index
    %c0_194 = arith.constant 0 : index
    %363 = vector.load %arg8[%c0_193, %c0_194] : memref<1x128xf32, #tpu.memory_space<vmem>>, vector<1x128xf32>
    %364 = vector.broadcast %363 : vector<1x128xf32> to vector<2x128xf32>
    %365 = arith.addf %362, %364 : vector<2x128xf32>
    %366 = arith.index_cast %c1_i32_187 : i32 to index
    %c0_195 = arith.constant 0 : index
    %c0_196 = arith.constant 0 : index
    %367 = vector.load %arg13[%366, %c0_195, %c0_196] : memref<8x2x128xf32, #tpu.memory_space<vmem>>, vector<1x2x128xf32>
    %368 = vector.shape_cast %367 : vector<1x2x128xf32> to vector<2x128xf32>
    %369 = vector.shape_cast %365 : vector<2x128xf32> to vector<1x2x128xf32>
    tpu.vector_store %arg13[%366, %c0_195, %c0_196], %369 {strides = array<i32>} : memref<8x2x128xf32, #tpu.memory_space<vmem>>, vector<1x2x128xf32>,
    %c2_i32_197 = arith.constant 2 : i32
    %370 = arith.index_cast %c2_i32_197 : i32 to index
    %c0_198 = arith.constant 0 : index
    %c0_199 = arith.constant 0 : index
    %371 = vector.load %arg12[%370, %c0_198, %c0_199] : memref<8x2x32xf32, #tpu.memory_space<vmem>>, vector<1x2x32xf32>
    %372 = vector.shape_cast %371 : vector<1x2x32xf32> to vector<2x32xf32>
    %c0_200 = arith.constant 0 : index
    %c0_201 = arith.constant 0 : index
    %373 = vector.load %arg6[%c0_200, %c0_201] : memref<32x128xf32, #tpu.memory_space<vmem>>, vector<32x128xf32>
    %cst_202 = arith.constant dense<0.000000e+00> : vector<2x128xf32>
    %374 = tpu.matmul %372, %373, %cst_202 {dimension_numbers = #tpu.dot_dimension_numbers<[1], [0], [0], [1], [0, 0, 1, 1], [], []>} : vector<2x32xf32>, vector<32x128xf32>, vector<2x128xf32> -> vector<2x128xf32>
    %c0_203 = arith.constant 0 : index
    %c0_204 = arith.constant 0 : index
    %375 = vector.load %arg8[%c0_203, %c0_204] : memref<1x128xf32, #tpu.memory_space<vmem>>, vector<1x128xf32>
    %376 = vector.broadcast %375 : vector<1x128xf32> to vector<2x128xf32>
    %377 = arith.addf %374, %376 : vector<2x128xf32>
    %378 = arith.index_cast %c2_i32_197 : i32 to index
    %c0_205 = arith.constant 0 : index
    %c0_206 = arith.constant 0 : index
    %379 = vector.load %arg13[%378, %c0_205, %c0_206] : memref<8x2x128xf32, #tpu.memory_space<vmem>>, vector<1x2x128xf32>
    %380 = vector.shape_cast %379 : vector<1x2x128xf32> to vector<2x128xf32>
    %381 = vector.shape_cast %377 : vector<2x128xf32> to vector<1x2x128xf32>
    tpu.vector_store %arg13[%378, %c0_205, %c0_206], %381 {strides = array<i32>} : memref<8x2x128xf32, #tpu.memory_space<vmem>>, vector<1x2x128xf32>,
    %c3_i32_207 = arith.constant 3 : i32
    %382 = arith.index_cast %c3_i32_207 : i32 to index
    %c0_208 = arith.constant 0 : index
    %c0_209 = arith.constant 0 : index
    %383 = vector.load %arg12[%382, %c0_208, %c0_209] : memref<8x2x32xf32, #tpu.memory_space<vmem>>, vector<1x2x32xf32>
    %384 = vector.shape_cast %383 : vector<1x2x32xf32> to vector<2x32xf32>
    %c0_210 = arith.constant 0 : index
    %c0_211 = arith.constant 0 : index
    %385 = vector.load %arg6[%c0_210, %c0_211] : memref<32x128xf32, #tpu.memory_space<vmem>>, vector<32x128xf32>
    %cst_212 = arith.constant dense<0.000000e+00> : vector<2x128xf32>
    %386 = tpu.matmul %384, %385, %cst_212 {dimension_numbers = #tpu.dot_dimension_numbers<[1], [0], [0], [1], [0, 0, 1, 1], [], []>} : vector<2x32xf32>, vector<32x128xf32>, vector<2x128xf32> -> vector<2x128xf32>
    %c0_213 = arith.constant 0 : index
    %c0_214 = arith.constant 0 : index
    %387 = vector.load %arg8[%c0_213, %c0_214] : memref<1x128xf32, #tpu.memory_space<vmem>>, vector<1x128xf32>
    %388 = vector.broadcast %387 : vector<1x128xf32> to vector<2x128xf32>
    %389 = arith.addf %386, %388 : vector<2x128xf32>
    %390 = arith.index_cast %c3_i32_207 : i32 to index
    %c0_215 = arith.constant 0 : index
    %c0_216 = arith.constant 0 : index
    %391 = vector.load %arg13[%390, %c0_215, %c0_216] : memref<8x2x128xf32, #tpu.memory_space<vmem>>, vector<1x2x128xf32>
    %392 = vector.shape_cast %391 : vector<1x2x128xf32> to vector<2x128xf32>
    %393 = vector.shape_cast %389 : vector<2x128xf32> to vector<1x2x128xf32>
    tpu.vector_store %arg13[%390, %c0_215, %c0_216], %393 {strides = array<i32>} : memref<8x2x128xf32, #tpu.memory_space<vmem>>, vector<1x2x128xf32>,
    %c4_i32_217 = arith.constant 4 : i32
    %394 = arith.index_cast %c4_i32_217 : i32 to index
    %c0_218 = arith.constant 0 : index
    %c0_219 = arith.constant 0 : index
    %395 = vector.load %arg12[%394, %c0_218, %c0_219] : memref<8x2x32xf32, #tpu.memory_space<vmem>>, vector<1x2x32xf32>
    %396 = vector.shape_cast %395 : vector<1x2x32xf32> to vector<2x32xf32>
    %c0_220 = arith.constant 0 : index
    %c0_221 = arith.constant 0 : index
    %397 = vector.load %arg6[%c0_220, %c0_221] : memref<32x128xf32, #tpu.memory_space<vmem>>, vector<32x128xf32>
    %cst_222 = arith.constant dense<0.000000e+00> : vector<2x128xf32>
    %398 = tpu.matmul %396, %397, %cst_222 {dimension_numbers = #tpu.dot_dimension_numbers<[1], [0], [0], [1], [0, 0, 1, 1], [], []>} : vector<2x32xf32>, vector<32x128xf32>, vector<2x128xf32> -> vector<2x128xf32>
    %c0_223 = arith.constant 0 : index
    %c0_224 = arith.constant 0 : index
    %399 = vector.load %arg8[%c0_223, %c0_224] : memref<1x128xf32, #tpu.memory_space<vmem>>, vector<1x128xf32>
    %400 = vector.broadcast %399 : vector<1x128xf32> to vector<2x128xf32>
    %401 = arith.addf %398, %400 : vector<2x128xf32>
    %402 = arith.index_cast %c4_i32_217 : i32 to index
    %c0_225 = arith.constant 0 : index
    %c0_226 = arith.constant 0 : index
    %403 = vector.load %arg13[%402, %c0_225, %c0_226] : memref<8x2x128xf32, #tpu.memory_space<vmem>>, vector<1x2x128xf32>
    %404 = vector.shape_cast %403 : vector<1x2x128xf32> to vector<2x128xf32>
    %405 = vector.shape_cast %401 : vector<2x128xf32> to vector<1x2x128xf32>
    tpu.vector_store %arg13[%402, %c0_225, %c0_226], %405 {strides = array<i32>} : memref<8x2x128xf32, #tpu.memory_space<vmem>>, vector<1x2x128xf32>,
    %c5_i32_227 = arith.constant 5 : i32
    %406 = arith.index_cast %c5_i32_227 : i32 to index
    %c0_228 = arith.constant 0 : index
    %c0_229 = arith.constant 0 : index
    %407 = vector.load %arg12[%406, %c0_228, %c0_229] : memref<8x2x32xf32, #tpu.memory_space<vmem>>, vector<1x2x32xf32>
    %408 = vector.shape_cast %407 : vector<1x2x32xf32> to vector<2x32xf32>
    %c0_230 = arith.constant 0 : index
    %c0_231 = arith.constant 0 : index
    %409 = vector.load %arg6[%c0_230, %c0_231] : memref<32x128xf32, #tpu.memory_space<vmem>>, vector<32x128xf32>
    %cst_232 = arith.constant dense<0.000000e+00> : vector<2x128xf32>
    %410 = tpu.matmul %408, %409, %cst_232 {dimension_numbers = #tpu.dot_dimension_numbers<[1], [0], [0], [1], [0, 0, 1, 1], [], []>} : vector<2x32xf32>, vector<32x128xf32>, vector<2x128xf32> -> vector<2x128xf32>
    %c0_233 = arith.constant 0 : index
    %c0_234 = arith.constant 0 : index
    %411 = vector.load %arg8[%c0_233, %c0_234] : memref<1x128xf32, #tpu.memory_space<vmem>>, vector<1x128xf32>
    %412 = vector.broadcast %411 : vector<1x128xf32> to vector<2x128xf32>
    %413 = arith.addf %410, %412 : vector<2x128xf32>
    %414 = arith.index_cast %c5_i32_227 : i32 to index
    %c0_235 = arith.constant 0 : index
    %c0_236 = arith.constant 0 : index
    %415 = vector.load %arg13[%414, %c0_235, %c0_236] : memref<8x2x128xf32, #tpu.memory_space<vmem>>, vector<1x2x128xf32>
    %416 = vector.shape_cast %415 : vector<1x2x128xf32> to vector<2x128xf32>
    %417 = vector.shape_cast %413 : vector<2x128xf32> to vector<1x2x128xf32>
    tpu.vector_store %arg13[%414, %c0_235, %c0_236], %417 {strides = array<i32>} : memref<8x2x128xf32, #tpu.memory_space<vmem>>, vector<1x2x128xf32>,
    %c6_i32_237 = arith.constant 6 : i32
    %418 = arith.index_cast %c6_i32_237 : i32 to index
    %c0_238 = arith.constant 0 : index
    %c0_239 = arith.constant 0 : index
    %419 = vector.load %arg12[%418, %c0_238, %c0_239] : memref<8x2x32xf32, #tpu.memory_space<vmem>>, vector<1x2x32xf32>
    %420 = vector.shape_cast %419 : vector<1x2x32xf32> to vector<2x32xf32>
    %c0_240 = arith.constant 0 : index
    %c0_241 = arith.constant 0 : index
    %421 = vector.load %arg6[%c0_240, %c0_241] : memref<32x128xf32, #tpu.memory_space<vmem>>, vector<32x128xf32>
    %cst_242 = arith.constant dense<0.000000e+00> : vector<2x128xf32>
    %422 = tpu.matmul %420, %421, %cst_242 {dimension_numbers = #tpu.dot_dimension_numbers<[1], [0], [0], [1], [0, 0, 1, 1], [], []>} : vector<2x32xf32>, vector<32x128xf32>, vector<2x128xf32> -> vector<2x128xf32>
    %c0_243 = arith.constant 0 : index
    %c0_244 = arith.constant 0 : index
    %423 = vector.load %arg8[%c0_243, %c0_244] : memref<1x128xf32, #tpu.memory_space<vmem>>, vector<1x128xf32>
    %424 = vector.broadcast %423 : vector<1x128xf32> to vector<2x128xf32>
    %425 = arith.addf %422, %424 : vector<2x128xf32>
    %426 = arith.index_cast %c6_i32_237 : i32 to index
    %c0_245 = arith.constant 0 : index
    %c0_246 = arith.constant 0 : index
    %427 = vector.load %arg13[%426, %c0_245, %c0_246] : memref<8x2x128xf32, #tpu.memory_space<vmem>>, vector<1x2x128xf32>
    %428 = vector.shape_cast %427 : vector<1x2x128xf32> to vector<2x128xf32>
    %429 = vector.shape_cast %425 : vector<2x128xf32> to vector<1x2x128xf32>
    tpu.vector_store %arg13[%426, %c0_245, %c0_246], %429 {strides = array<i32>} : memref<8x2x128xf32, #tpu.memory_space<vmem>>, vector<1x2x128xf32>,
    %c7_i32_247 = arith.constant 7 : i32
    %430 = arith.index_cast %c7_i32_247 : i32 to index
    %c0_248 = arith.constant 0 : index
    %c0_249 = arith.constant 0 : index
    %431 = vector.load %arg12[%430, %c0_248, %c0_249] : memref<8x2x32xf32, #tpu.memory_space<vmem>>, vector<1x2x32xf32>
    %432 = vector.shape_cast %431 : vector<1x2x32xf32> to vector<2x32xf32>
    %c0_250 = arith.constant 0 : index
    %c0_251 = arith.constant 0 : index
    %433 = vector.load %arg6[%c0_250, %c0_251] : memref<32x128xf32, #tpu.memory_space<vmem>>, vector<32x128xf32>
    %cst_252 = arith.constant dense<0.000000e+00> : vector<2x128xf32>
    %434 = tpu.matmul %432, %433, %cst_252 {dimension_numbers = #tpu.dot_dimension_numbers<[1], [0], [0], [1], [0, 0, 1, 1], [], []>} : vector<2x32xf32>, vector<32x128xf32>, vector<2x128xf32> -> vector<2x128xf32>
    %c0_253 = arith.constant 0 : index
    %c0_254 = arith.constant 0 : index
    %435 = vector.load %arg8[%c0_253, %c0_254] : memref<1x128xf32, #tpu.memory_space<vmem>>, vector<1x128xf32>
    %436 = vector.broadcast %435 : vector<1x128xf32> to vector<2x128xf32>
    %437 = arith.addf %434, %436 : vector<2x128xf32>
    %438 = arith.index_cast %c7_i32_247 : i32 to index
    %c0_255 = arith.constant 0 : index
    %c0_256 = arith.constant 0 : index
    %439 = vector.load %arg13[%438, %c0_255, %c0_256] : memref<8x2x128xf32, #tpu.memory_space<vmem>>, vector<1x2x128xf32>
    %440 = vector.shape_cast %439 : vector<1x2x128xf32> to vector<2x128xf32>
    %441 = vector.shape_cast %437 : vector<2x128xf32> to vector<1x2x128xf32>
    tpu.vector_store %arg13[%438, %c0_255, %c0_256], %441 {strides = array<i32>} : memref<8x2x128xf32, #tpu.memory_space<vmem>>, vector<1x2x128xf32>,
    %c8_i32_257 = arith.constant 8 : i32
    %cst_258 = arith.constant 0.000000e+00 : f32
    %442 = vector.broadcast %cst_258 : f32 to vector<2x32xf32>
    %cst_259 = arith.constant 0.000000e+00 : f32
    %443 = vector.broadcast %cst_259 : f32 to vector<2x32xf32>
    %c0_i32_260 = arith.constant 0 : i32
    %444 = arith.index_cast %c0_i32_260 : i32 to index
    %c0_261 = arith.constant 0 : index
    %c0_262 = arith.constant 0 : index
    %445 = vector.load %arg13[%444, %c0_261, %c0_262] : memref<8x2x128xf32, #tpu.memory_space<vmem>>, vector<1x2x128xf32>
    %446 = vector.shape_cast %445 : vector<1x2x128xf32> to vector<2x128xf32>
    %c0_263 = arith.constant 0 : index
    %c0_264 = arith.constant 0 : index
    %447 = vector.load %arg7[%c0_263, %c0_264] : memref<32x128xf32, #tpu.memory_space<vmem>>, vector<32x128xf32>
    %cst_265 = arith.constant dense<0.000000e+00> : vector<2x128xf32>
    %448 = tpu.matmul %442, %447, %cst_265 {dimension_numbers = #tpu.dot_dimension_numbers<[1], [0], [0], [1], [0, 0, 1, 1], [], []>} : vector<2x32xf32>, vector<32x128xf32>, vector<2x128xf32> -> vector<2x128xf32>
    %449 = arith.addf %446, %448 : vector<2x128xf32>
    %450 = arith.negf %449 : vector<2x128xf32>
    %451 = math.exp %450 : vector<2x128xf32>
    %cst_266 = arith.constant 1.000000e+00 : f32
    %452 = vector.broadcast %cst_266 : f32 to vector<2x128xf32>
    %453 = arith.addf %452, %451 : vector<2x128xf32>
    %454 = arith.divf %452, %453 : vector<2x128xf32>
    %455 = math.tanh %449 : vector<2x128xf32>
    %456 = vector.extract_strided_slice %454 {offsets = [0, 0], sizes = [2, 32], strides = [1, 1]} : vector<2x128xf32> to vector<2x32xf32>
    %457 = vector.extract_strided_slice %454 {offsets = [0, 32], sizes = [2, 32], strides = [1, 1]} : vector<2x128xf32> to vector<2x32xf32>
    %458 = vector.extract_strided_slice %455 {offsets = [0, 64], sizes = [2, 32], strides = [1, 1]} : vector<2x128xf32> to vector<2x32xf32>
    %459 = vector.extract_strided_slice %454 {offsets = [0, 96], sizes = [2, 32], strides = [1, 1]} : vector<2x128xf32> to vector<2x32xf32>
    %460 = arith.mulf %457, %443 : vector<2x32xf32>
    %461 = arith.mulf %456, %458 : vector<2x32xf32>
    %462 = arith.addf %460, %461 : vector<2x32xf32>
    %463 = math.tanh %462 : vector<2x32xf32>
    %464 = arith.mulf %459, %463 : vector<2x32xf32>
    %c1_i32_267 = arith.constant 1 : i32
    %465 = arith.index_cast %c1_i32_267 : i32 to index
    %c0_268 = arith.constant 0 : index
    %c0_269 = arith.constant 0 : index
    %466 = vector.load %arg13[%465, %c0_268, %c0_269] : memref<8x2x128xf32, #tpu.memory_space<vmem>>, vector<1x2x128xf32>
    %467 = vector.shape_cast %466 : vector<1x2x128xf32> to vector<2x128xf32>
    %c0_270 = arith.constant 0 : index
    %c0_271 = arith.constant 0 : index
    %468 = vector.load %arg7[%c0_270, %c0_271] : memref<32x128xf32, #tpu.memory_space<vmem>>, vector<32x128xf32>
    %cst_272 = arith.constant dense<0.000000e+00> : vector<2x128xf32>
    %469 = tpu.matmul %464, %468, %cst_272 {dimension_numbers = #tpu.dot_dimension_numbers<[1], [0], [0], [1], [0, 0, 1, 1], [], []>} : vector<2x32xf32>, vector<32x128xf32>, vector<2x128xf32> -> vector<2x128xf32>
    %470 = arith.addf %467, %469 : vector<2x128xf32>
    %471 = arith.negf %470 : vector<2x128xf32>
    %472 = math.exp %471 : vector<2x128xf32>
    %cst_273 = arith.constant 1.000000e+00 : f32
    %473 = vector.broadcast %cst_273 : f32 to vector<2x128xf32>
    %474 = arith.addf %473, %472 : vector<2x128xf32>
    %475 = arith.divf %473, %474 : vector<2x128xf32>
    %476 = math.tanh %470 : vector<2x128xf32>
    %477 = vector.extract_strided_slice %475 {offsets = [0, 0], sizes = [2, 32], strides = [1, 1]} : vector<2x128xf32> to vector<2x32xf32>
    %478 = vector.extract_strided_slice %475 {offsets = [0, 32], sizes = [2, 32], strides = [1, 1]} : vector<2x128xf32> to vector<2x32xf32>
    %479 = vector.extract_strided_slice %476 {offsets = [0, 64], sizes = [2, 32], strides = [1, 1]} : vector<2x128xf32> to vector<2x32xf32>
    %480 = vector.extract_strided_slice %475 {offsets = [0, 96], sizes = [2, 32], strides = [1, 1]} : vector<2x128xf32> to vector<2x32xf32>
    %481 = arith.mulf %478, %462 : vector<2x32xf32>
    %482 = arith.mulf %477, %479 : vector<2x32xf32>
    %483 = arith.addf %481, %482 : vector<2x32xf32>
    %484 = math.tanh %483 : vector<2x32xf32>
    %485 = arith.mulf %480, %484 : vector<2x32xf32>
    %c2_i32_274 = arith.constant 2 : i32
    %486 = arith.index_cast %c2_i32_274 : i32 to index
    %c0_275 = arith.constant 0 : index
    %c0_276 = arith.constant 0 : index
    %487 = vector.load %arg13[%486, %c0_275, %c0_276] : memref<8x2x128xf32, #tpu.memory_space<vmem>>, vector<1x2x128xf32>
    %488 = vector.shape_cast %487 : vector<1x2x128xf32> to vector<2x128xf32>
    %c0_277 = arith.constant 0 : index
    %c0_278 = arith.constant 0 : index
    %489 = vector.load %arg7[%c0_277, %c0_278] : memref<32x128xf32, #tpu.memory_space<vmem>>, vector<32x128xf32>
    %cst_279 = arith.constant dense<0.000000e+00> : vector<2x128xf32>
    %490 = tpu.matmul %485, %489, %cst_279 {dimension_numbers = #tpu.dot_dimension_numbers<[1], [0], [0], [1], [0, 0, 1, 1], [], []>} : vector<2x32xf32>, vector<32x128xf32>, vector<2x128xf32> -> vector<2x128xf32>
    %491 = arith.addf %488, %490 : vector<2x128xf32>
    %492 = arith.negf %491 : vector<2x128xf32>
    %493 = math.exp %492 : vector<2x128xf32>
    %cst_280 = arith.constant 1.000000e+00 : f32
    %494 = vector.broadcast %cst_280 : f32 to vector<2x128xf32>
    %495 = arith.addf %494, %493 : vector<2x128xf32>
    %496 = arith.divf %494, %495 : vector<2x128xf32>
    %497 = math.tanh %491 : vector<2x128xf32>
    %498 = vector.extract_strided_slice %496 {offsets = [0, 0], sizes = [2, 32], strides = [1, 1]} : vector<2x128xf32> to vector<2x32xf32>
    %499 = vector.extract_strided_slice %496 {offsets = [0, 32], sizes = [2, 32], strides = [1, 1]} : vector<2x128xf32> to vector<2x32xf32>
    %500 = vector.extract_strided_slice %497 {offsets = [0, 64], sizes = [2, 32], strides = [1, 1]} : vector<2x128xf32> to vector<2x32xf32>
    %501 = vector.extract_strided_slice %496 {offsets = [0, 96], sizes = [2, 32], strides = [1, 1]} : vector<2x128xf32> to vector<2x32xf32>
    %502 = arith.mulf %499, %483 : vector<2x32xf32>
    %503 = arith.mulf %498, %500 : vector<2x32xf32>
    %504 = arith.addf %502, %503 : vector<2x32xf32>
    %505 = math.tanh %504 : vector<2x32xf32>
    %506 = arith.mulf %501, %505 : vector<2x32xf32>
    %c3_i32_281 = arith.constant 3 : i32
    %507 = arith.index_cast %c3_i32_281 : i32 to index
    %c0_282 = arith.constant 0 : index
    %c0_283 = arith.constant 0 : index
    %508 = vector.load %arg13[%507, %c0_282, %c0_283] : memref<8x2x128xf32, #tpu.memory_space<vmem>>, vector<1x2x128xf32>
    %509 = vector.shape_cast %508 : vector<1x2x128xf32> to vector<2x128xf32>
    %c0_284 = arith.constant 0 : index
    %c0_285 = arith.constant 0 : index
    %510 = vector.load %arg7[%c0_284, %c0_285] : memref<32x128xf32, #tpu.memory_space<vmem>>, vector<32x128xf32>
    %cst_286 = arith.constant dense<0.000000e+00> : vector<2x128xf32>
    %511 = tpu.matmul %506, %510, %cst_286 {dimension_numbers = #tpu.dot_dimension_numbers<[1], [0], [0], [1], [0, 0, 1, 1], [], []>} : vector<2x32xf32>, vector<32x128xf32>, vector<2x128xf32> -> vector<2x128xf32>
    %512 = arith.addf %509, %511 : vector<2x128xf32>
    %513 = arith.negf %512 : vector<2x128xf32>
    %514 = math.exp %513 : vector<2x128xf32>
    %cst_287 = arith.constant 1.000000e+00 : f32
    %515 = vector.broadcast %cst_287 : f32 to vector<2x128xf32>
    %516 = arith.addf %515, %514 : vector<2x128xf32>
    %517 = arith.divf %515, %516 : vector<2x128xf32>
    %518 = math.tanh %512 : vector<2x128xf32>
    %519 = vector.extract_strided_slice %517 {offsets = [0, 0], sizes = [2, 32], strides = [1, 1]} : vector<2x128xf32> to vector<2x32xf32>
    %520 = vector.extract_strided_slice %517 {offsets = [0, 32], sizes = [2, 32], strides = [1, 1]} : vector<2x128xf32> to vector<2x32xf32>
    %521 = vector.extract_strided_slice %518 {offsets = [0, 64], sizes = [2, 32], strides = [1, 1]} : vector<2x128xf32> to vector<2x32xf32>
    %522 = vector.extract_strided_slice %517 {offsets = [0, 96], sizes = [2, 32], strides = [1, 1]} : vector<2x128xf32> to vector<2x32xf32>
    %523 = arith.mulf %520, %504 : vector<2x32xf32>
    %524 = arith.mulf %519, %521 : vector<2x32xf32>
    %525 = arith.addf %523, %524 : vector<2x32xf32>
    %526 = math.tanh %525 : vector<2x32xf32>
    %527 = arith.mulf %522, %526 : vector<2x32xf32>
    %c4_i32_288 = arith.constant 4 : i32
    %528 = arith.index_cast %c4_i32_288 : i32 to index
    %c0_289 = arith.constant 0 : index
    %c0_290 = arith.constant 0 : index
    %529 = vector.load %arg13[%528, %c0_289, %c0_290] : memref<8x2x128xf32, #tpu.memory_space<vmem>>, vector<1x2x128xf32>
    %530 = vector.shape_cast %529 : vector<1x2x128xf32> to vector<2x128xf32>
    %c0_291 = arith.constant 0 : index
    %c0_292 = arith.constant 0 : index
    %531 = vector.load %arg7[%c0_291, %c0_292] : memref<32x128xf32, #tpu.memory_space<vmem>>, vector<32x128xf32>
    %cst_293 = arith.constant dense<0.000000e+00> : vector<2x128xf32>
    %532 = tpu.matmul %527, %531, %cst_293 {dimension_numbers = #tpu.dot_dimension_numbers<[1], [0], [0], [1], [0, 0, 1, 1], [], []>} : vector<2x32xf32>, vector<32x128xf32>, vector<2x128xf32> -> vector<2x128xf32>
    %533 = arith.addf %530, %532 : vector<2x128xf32>
    %534 = arith.negf %533 : vector<2x128xf32>
    %535 = math.exp %534 : vector<2x128xf32>
    %cst_294 = arith.constant 1.000000e+00 : f32
    %536 = vector.broadcast %cst_294 : f32 to vector<2x128xf32>
    %537 = arith.addf %536, %535 : vector<2x128xf32>
    %538 = arith.divf %536, %537 : vector<2x128xf32>
    %539 = math.tanh %533 : vector<2x128xf32>
    %540 = vector.extract_strided_slice %538 {offsets = [0, 0], sizes = [2, 32], strides = [1, 1]} : vector<2x128xf32> to vector<2x32xf32>
    %541 = vector.extract_strided_slice %538 {offsets = [0, 32], sizes = [2, 32], strides = [1, 1]} : vector<2x128xf32> to vector<2x32xf32>
    %542 = vector.extract_strided_slice %539 {offsets = [0, 64], sizes = [2, 32], strides = [1, 1]} : vector<2x128xf32> to vector<2x32xf32>
    %543 = vector.extract_strided_slice %538 {offsets = [0, 96], sizes = [2, 32], strides = [1, 1]} : vector<2x128xf32> to vector<2x32xf32>
    %544 = arith.mulf %541, %525 : vector<2x32xf32>
    %545 = arith.mulf %540, %542 : vector<2x32xf32>
    %546 = arith.addf %544, %545 : vector<2x32xf32>
    %547 = math.tanh %546 : vector<2x32xf32>
    %548 = arith.mulf %543, %547 : vector<2x32xf32>
    %c5_i32_295 = arith.constant 5 : i32
    %549 = arith.index_cast %c5_i32_295 : i32 to index
    %c0_296 = arith.constant 0 : index
    %c0_297 = arith.constant 0 : index
    %550 = vector.load %arg13[%549, %c0_296, %c0_297] : memref<8x2x128xf32, #tpu.memory_space<vmem>>, vector<1x2x128xf32>
    %551 = vector.shape_cast %550 : vector<1x2x128xf32> to vector<2x128xf32>
    %c0_298 = arith.constant 0 : index
    %c0_299 = arith.constant 0 : index
    %552 = vector.load %arg7[%c0_298, %c0_299] : memref<32x128xf32, #tpu.memory_space<vmem>>, vector<32x128xf32>
    %cst_300 = arith.constant dense<0.000000e+00> : vector<2x128xf32>
    %553 = tpu.matmul %548, %552, %cst_300 {dimension_numbers = #tpu.dot_dimension_numbers<[1], [0], [0], [1], [0, 0, 1, 1], [], []>} : vector<2x32xf32>, vector<32x128xf32>, vector<2x128xf32> -> vector<2x128xf32>
    %554 = arith.addf %551, %553 : vector<2x128xf32>
    %555 = arith.negf %554 : vector<2x128xf32>
    %556 = math.exp %555 : vector<2x128xf32>
    %cst_301 = arith.constant 1.000000e+00 : f32
    %557 = vector.broadcast %cst_301 : f32 to vector<2x128xf32>
    %558 = arith.addf %557, %556 : vector<2x128xf32>
    %559 = arith.divf %557, %558 : vector<2x128xf32>
    %560 = math.tanh %554 : vector<2x128xf32>
    %561 = vector.extract_strided_slice %559 {offsets = [0, 0], sizes = [2, 32], strides = [1, 1]} : vector<2x128xf32> to vector<2x32xf32>
    %562 = vector.extract_strided_slice %559 {offsets = [0, 32], sizes = [2, 32], strides = [1, 1]} : vector<2x128xf32> to vector<2x32xf32>
    %563 = vector.extract_strided_slice %560 {offsets = [0, 64], sizes = [2, 32], strides = [1, 1]} : vector<2x128xf32> to vector<2x32xf32>
    %564 = vector.extract_strided_slice %559 {offsets = [0, 96], sizes = [2, 32], strides = [1, 1]} : vector<2x128xf32> to vector<2x32xf32>
    %565 = arith.mulf %562, %546 : vector<2x32xf32>
    %566 = arith.mulf %561, %563 : vector<2x32xf32>
    %567 = arith.addf %565, %566 : vector<2x32xf32>
    %568 = math.tanh %567 : vector<2x32xf32>
    %569 = arith.mulf %564, %568 : vector<2x32xf32>
    %c6_i32_302 = arith.constant 6 : i32
    %570 = arith.index_cast %c6_i32_302 : i32 to index
    %c0_303 = arith.constant 0 : index
    %c0_304 = arith.constant 0 : index
    %571 = vector.load %arg13[%570, %c0_303, %c0_304] : memref<8x2x128xf32, #tpu.memory_space<vmem>>, vector<1x2x128xf32>
    %572 = vector.shape_cast %571 : vector<1x2x128xf32> to vector<2x128xf32>
    %c0_305 = arith.constant 0 : index
    %c0_306 = arith.constant 0 : index
    %573 = vector.load %arg7[%c0_305, %c0_306] : memref<32x128xf32, #tpu.memory_space<vmem>>, vector<32x128xf32>
    %cst_307 = arith.constant dense<0.000000e+00> : vector<2x128xf32>
    %574 = tpu.matmul %569, %573, %cst_307 {dimension_numbers = #tpu.dot_dimension_numbers<[1], [0], [0], [1], [0, 0, 1, 1], [], []>} : vector<2x32xf32>, vector<32x128xf32>, vector<2x128xf32> -> vector<2x128xf32>
    %575 = arith.addf %572, %574 : vector<2x128xf32>
    %576 = arith.negf %575 : vector<2x128xf32>
    %577 = math.exp %576 : vector<2x128xf32>
    %cst_308 = arith.constant 1.000000e+00 : f32
    %578 = vector.broadcast %cst_308 : f32 to vector<2x128xf32>
    %579 = arith.addf %578, %577 : vector<2x128xf32>
    %580 = arith.divf %578, %579 : vector<2x128xf32>
    %581 = math.tanh %575 : vector<2x128xf32>
    %582 = vector.extract_strided_slice %580 {offsets = [0, 0], sizes = [2, 32], strides = [1, 1]} : vector<2x128xf32> to vector<2x32xf32>
    %583 = vector.extract_strided_slice %580 {offsets = [0, 32], sizes = [2, 32], strides = [1, 1]} : vector<2x128xf32> to vector<2x32xf32>
    %584 = vector.extract_strided_slice %581 {offsets = [0, 64], sizes = [2, 32], strides = [1, 1]} : vector<2x128xf32> to vector<2x32xf32>
    %585 = vector.extract_strided_slice %580 {offsets = [0, 96], sizes = [2, 32], strides = [1, 1]} : vector<2x128xf32> to vector<2x32xf32>
    %586 = arith.mulf %583, %567 : vector<2x32xf32>
    %587 = arith.mulf %582, %584 : vector<2x32xf32>
    %588 = arith.addf %586, %587 : vector<2x32xf32>
    %589 = math.tanh %588 : vector<2x32xf32>
    %590 = arith.mulf %585, %589 : vector<2x32xf32>
    %c7_i32_309 = arith.constant 7 : i32
    %591 = arith.index_cast %c7_i32_309 : i32 to index
    %c0_310 = arith.constant 0 : index
    %c0_311 = arith.constant 0 : index
    %592 = vector.load %arg13[%591, %c0_310, %c0_311] : memref<8x2x128xf32, #tpu.memory_space<vmem>>, vector<1x2x128xf32>
    %593 = vector.shape_cast %592 : vector<1x2x128xf32> to vector<2x128xf32>
    %c0_312 = arith.constant 0 : index
    %c0_313 = arith.constant 0 : index
    %594 = vector.load %arg7[%c0_312, %c0_313] : memref<32x128xf32, #tpu.memory_space<vmem>>, vector<32x128xf32>
    %cst_314 = arith.constant dense<0.000000e+00> : vector<2x128xf32>
    %595 = tpu.matmul %590, %594, %cst_314 {dimension_numbers = #tpu.dot_dimension_numbers<[1], [0], [0], [1], [0, 0, 1, 1], [], []>} : vector<2x32xf32>, vector<32x128xf32>, vector<2x128xf32> -> vector<2x128xf32>
    %596 = arith.addf %593, %595 : vector<2x128xf32>
    %597 = arith.negf %596 : vector<2x128xf32>
    %598 = math.exp %597 : vector<2x128xf32>
    %cst_315 = arith.constant 1.000000e+00 : f32
    %599 = vector.broadcast %cst_315 : f32 to vector<2x128xf32>
    %600 = arith.addf %599, %598 : vector<2x128xf32>
    %601 = arith.divf %599, %600 : vector<2x128xf32>
    %602 = math.tanh %596 : vector<2x128xf32>
    %603 = vector.extract_strided_slice %601 {offsets = [0, 0], sizes = [2, 32], strides = [1, 1]} : vector<2x128xf32> to vector<2x32xf32>
    %604 = vector.extract_strided_slice %601 {offsets = [0, 32], sizes = [2, 32], strides = [1, 1]} : vector<2x128xf32> to vector<2x32xf32>
    %605 = vector.extract_strided_slice %602 {offsets = [0, 64], sizes = [2, 32], strides = [1, 1]} : vector<2x128xf32> to vector<2x32xf32>
    %606 = vector.extract_strided_slice %601 {offsets = [0, 96], sizes = [2, 32], strides = [1, 1]} : vector<2x128xf32> to vector<2x32xf32>
    %607 = arith.mulf %604, %588 : vector<2x32xf32>
    %608 = arith.mulf %603, %605 : vector<2x32xf32>
    %609 = arith.addf %607, %608 : vector<2x32xf32>
    %610 = math.tanh %609 : vector<2x32xf32>
    %611 = arith.mulf %606, %610 : vector<2x32xf32>
    %c8_i32_316 = arith.constant 8 : i32
    %c0_317 = arith.constant 0 : index
    %c0_318 = arith.constant 0 : index
    %612 = vector.load %arg9[%c0_317, %c0_318] : memref<1x32xf32, #tpu.memory_space<vmem>>, vector<1x32xf32>
    %613 = vector.broadcast %612 : vector<1x32xf32> to vector<2x32xf32>
    %614 = arith.mulf %611, %613 : vector<2x32xf32>
    %cst_319 = arith.constant dense<0.000000e+00> : vector<2xf32>
    %615 = vector.multi_reduction <add>, %614, %cst_319 [1] : vector<2x32xf32> to vector<2xf32>
    %616 = vector.shape_cast %615 : vector<2xf32> to vector<2x1xf32>
    %c0_320 = arith.constant 0 : index
    %c0_321 = arith.constant 0 : index
    %617 = vector.load %arg10[%c0_320, %c0_321] : memref<1x1xf32, #tpu.memory_space<vmem>>, vector<1x1xf32>
    %618 = vector.broadcast %617 : vector<1x1xf32> to vector<2x1xf32>
    %619 = arith.addf %616, %618 : vector<2x1xf32>
    %c0_322 = arith.constant 0 : index
    %c0_323 = arith.constant 0 : index
    %620 = vector.load %arg11[%c0_322, %c0_323] : memref<2x1xf32, #tpu.memory_space<vmem>>, vector<2x1xf32>
    tpu.vector_store %arg11[%c0_322, %c0_323], %619 {strides = array<i32>} : memref<2x1xf32, #tpu.memory_space<vmem>>, vector<2x1xf32>,
    return
  }
}

</mosaic_0001>

<bundles_post_ra>
// kernel: tpu_custom_call.1
= control target key start
LH: loop header
LB: loop body
LE: loop exit
PB: predicated region body
PF: predicated region fallthrough
CT: control target
= control target key end

     0   :  { %s4804_s0 = inlined_call_operand.hbm [shape: f32[8,2,16], index: 0, kind: input, shape index: {}]   ;;  %s4805_s1 = inlined_call_operand.vmem [shape: f32[1,16], index: 1, kind: input, shape index: {}]   ;;  %s4806_s2 = inlined_call_operand.vmem [shape: f32[1,16], index: 2, kind: input, shape index: {}]   ;;  %s4807_s3 = inlined_call_operand.hbm [shape: f32[16,128], index: 3, kind: input, shape index: {}]   ;;  %s4808_s4 = inlined_call_operand.hbm [shape: f32[32,128], index: 4, kind: input, shape index: {}]   ;;  %s4809_s5 = inlined_call_operand.vmem [shape: f32[1,128], index: 5, kind: input, shape index: {}]   ;;  %s4810_s6 = inlined_call_operand.hbm [shape: f32[32,128], index: 6, kind: input, shape index: {}]   ;;  %s4811_s7 = inlined_call_operand.hbm [shape: f32[32,128], index: 7, kind: input, shape index: {}]   ;;  %s4812_s8 = inlined_call_operand.vmem [shape: f32[1,128], index: 8, kind: input, shape index: {}]   ;;  %s4813_s9 = inlined_call_operand.vmem [shape: f32[1,32], index: 9, kind: input, shape index: {}]   ;;  %s4814_s10 = inlined_call_operand.<no memory space> [shape: f32[1,1], index: 10, kind: input, shape index: {}]   ;;  %s4815_s11 = inlined_call_operand.vmem [shape: f32[2,1], index: 11, kind: output, shape index: {}]  }
   0x1   :  { %v16_v0 = vstv %s4814_s10 }
   0x2   :  { %17 = vst [vmem:[#allocation4] sm:$0x1] %v16_v0 }
   0x3   :  { %18 = vsyncpa [#allocation6], 0 }
   0x4   :  { %19 = vsyncpa [#allocation8], 0 }
   0x5   :  { %20 = vsyncpa [#allocation11], 0  ;;  %s4288_s19 = smov [#allocation7]   ;;  %s4172_s23 = scalar_lea.hbm %s4807_s3, 256 }
   0x6   :  { %s42_s20 = sshll.u32 %s4288_s19, 4  ;;  %p4173_p0 = scmp.ne.s32.totalorder %s4807_s3, %s4172_s23  ;;  %s43_s20 = int_to_ptr.vmem [resolvable:$true] %s42_s20 }
   0x7   :  { %p4176_p1 = scmp.lt.u32.totalorder %s4172_s23, %s4807_s3 }
   0x9   :  { %p4178_p2 = pnand %p4176_p1, %p4173_p0 }
   0xb   :  { %4181 = shalt.err (!%p4178_p2)
}
   0xc   :  { %s4182_s10 = scalar_lea.vmem %s43_s20, 256  ;;  %p4187_p4 = scmp.lt.s32.totalorder %s43_s20, %s43_s20 }
   0xd   :  { %p4183_p3 = scmp.ne.s32.totalorder %s43_s20, %s4182_s10  ;;  %p4188_p5 = scmp.lt.s32.totalorder %s4182_s10, %s4182_s10 }
   0xf   :  { %p4189_p6 = por %p4188_p5, %p4187_p4 }
  0x11   :  { %p4190_p7 = pnand %p4189_p6, %p4183_p3 }
  0x13   :  { %4193 = shalt.err (!%p4190_p7)
}
  0x14   :  { %s4289_s28 = smov 128   ;;  %s4290_s29 = smov 8  }
  0x15   :  { %48 = dma.hbm_to_vmem [thread:$0]  %s4807_s3, 256, %s43_s20, [#allocation8], %s4289_s28, %s4289_s28, %s4290_s29  }
  0x16   :  { %s4291_s13 = smov [#allocation10]   ;;  %s4292_s15 = smov [#allocation5]  }
  0x17   :  { %s68_s14 = sshll.u32 %s4291_s13, 4  ;;  %s26_s16 = sshll.u32 %s4292_s15, 4  ;;  %s69_s14 = int_to_ptr.vmem [resolvable:$true] %s68_s14  ;;  %s27_s16 = int_to_ptr.vmem [resolvable:$true] %s26_s16 }
  0x18   :  { %s4194_s19 = scalar_lea.hbm %s4810_s6, 512 }
  0x19   :  { %p4195_p8 = scmp.ne.s32.totalorder %s4810_s6, %s4194_s19  ;;  %p4198_p9 = scmp.lt.u32.totalorder %s4194_s19, %s4810_s6 }
  0x1b   :  { %p4200_p10 = pnand %p4198_p9, %p4195_p8 }
  0x1d   :  { %4203 = shalt.err (!%p4200_p10)
}
  0x1e   :  { %s4204_s3 = scalar_lea.vmem %s69_s14, 512  ;;  %p4209_p12 = scmp.lt.s32.totalorder %s69_s14, %s69_s14 }
  0x1f   :  { %p4205_p11 = scmp.ne.s32.totalorder %s69_s14, %s4204_s3  ;;  %p4210_p13 = scmp.lt.s32.totalorder %s4204_s3, %s4204_s3 }
  0x21   :  { %p4211_p0 = por %p4210_p13, %p4209_p12 }
  0x23   :  { %p4212_p1 = pnand %p4211_p0, %p4205_p11 }
  0x25   :  { %4215 = shalt.err (!%p4212_p1)
}
  0x26   :  { %74 = dma.hbm_to_vmem [thread:$0]  %s4810_s6, 512, %s69_s14, [#allocation11], %s4289_s28, %s4289_s28, %s4290_s29  }
  0x27   :  { %s4216_s10 = scalar_lea.hbm %s4804_s0, 256 }
  0x28   :  { %p4217_p2 = scmp.ne.s32.totalorder %s4804_s0, %s4216_s10  ;;  %p4220_p3 = scmp.lt.u32.totalorder %s4216_s10, %s4804_s0 }
  0x2a   :  { %p4222_p4 = pnand %p4220_p3, %p4217_p2 }
  0x2c   :  { %4225 = shalt.err (!%p4222_p4)
}
  0x2d   :  { %s4226_s17 = scalar_lea.vmem %s27_s16, 256  ;;  %p4231_p6 = scmp.lt.s32.totalorder %s27_s16, %s27_s16 }
  0x2e   :  { %p4227_p5 = scmp.ne.s32.totalorder %s27_s16, %s4226_s17  ;;  %p4232_p7 = scmp.lt.s32.totalorder %s4226_s17, %s4226_s17 }
  0x30   :  { %p4233_p8 = por %p4232_p7, %p4231_p6 }
  0x32   :  { %p4234_p9 = pnand %p4233_p8, %p4227_p5 }
  0x34   :  { %4237 = shalt.err (!%p4234_p9)
}
  0x35   :  { %s4293_s6 = smov 32   ;;  %s4294_s14 = smov 2  }
  0x36   :  { %32 = dma.hbm_to_vmem [thread:$0]  %s4804_s0, 256, %s27_s16, [#allocation6], %s4293_s6, %s4293_s6, %s4294_s14  }
  0x37   :  { %s4295_s21 = smov [#allocation9]   ;;  %s4296_s23 = smov [#allocation12]  }
  0x38   :  { %s54_s22 = sshll.u32 %s4295_s21, 4  ;;  %s80_s24 = sshll.u32 %s4296_s23, 4  ;;  %s55_s22 = int_to_ptr.vmem [resolvable:$true] %s54_s22  ;;  %s81_s24 = int_to_ptr.vmem [resolvable:$true] %s80_s24 }
  0x39   :  { %s4238_s25 = scalar_lea.hbm %s4808_s4, 512 }
  0x3a   :  { %p4239_p10 = scmp.ne.s32.totalorder %s4808_s4, %s4238_s25  ;;  %p4242_p11 = scmp.lt.u32.totalorder %s4238_s25, %s4808_s4 }
  0x3c   :  { %p4244_p12 = pnand %p4242_p11, %p4239_p10 }
  0x3e   :  { %4247 = shalt.err (!%p4244_p12)
}
  0x3f   :  { %s4248_s0 = scalar_lea.vmem %s55_s22, 512  ;;  %p4253_p0 = scmp.lt.s32.totalorder %s55_s22, %s55_s22 }
  0x40   :  { %p4249_p13 = scmp.ne.s32.totalorder %s55_s22, %s4248_s0  ;;  %p4254_p1 = scmp.lt.s32.totalorder %s4248_s0, %s4248_s0 }
  0x42   :  { %p4255_p2 = por %p4254_p1, %p4253_p0 }
  0x44   :  { %p4256_p3 = pnand %p4255_p2, %p4249_p13 }
  0x46   :  { %4259 = shalt.err (!%p4256_p3)
}
  0x47   :  { %60 = dma.hbm_to_vmem [thread:$0]  %s4808_s4, 512, %s55_s22, [#allocation8], %s4289_s28, %s4289_s28, %s4290_s29  }
  0x48   :  { %s4260_s17 = scalar_lea.hbm %s4811_s7, 512 }
  0x49   :  { %p4261_p4 = scmp.ne.s32.totalorder %s4811_s7, %s4260_s17  ;;  %p4264_p5 = scmp.lt.u32.totalorder %s4260_s17, %s4811_s7 }
  0x4b   :  { %p4266_p6 = pnand %p4264_p5, %p4261_p4 }
  0x4d   :  { %4269 = shalt.err (!%p4266_p6)
}
  0x4e   :  { %s4270_s23 = scalar_lea.vmem %s81_s24, 512  ;;  %p4275_p8 = scmp.lt.s32.totalorder %s81_s24, %s81_s24 }
  0x4f   :  { %p4271_p7 = scmp.ne.s32.totalorder %s81_s24, %s4270_s23  ;;  %p4276_p9 = scmp.lt.s32.totalorder %s4270_s23, %s4270_s23 }
  0x51   :  { %p4277_p10 = por %p4276_p9, %p4275_p8 }
  0x53   :  { %p4278_p11 = pnand %p4277_p10, %p4271_p7 }
  0x55   :  { %4281 = shalt.err (!%p4278_p11)
}
  0x56   :  { %86 = dma.hbm_to_vmem [thread:$0]  %s4811_s7, 512, %s81_s24, [#allocation11], %s4289_s28, %s4289_s28, %s4290_s29  }
  0x57   :  { %4282 = dma.done.wait [#allocation6], 256  }
  0x58   :  { %4283 = vsyncadd [#allocation6], 4294967040 }
  0x59   :  { %4284 = dma.done.wait [#allocation8], 768  }
  0x5a   :  { %4285 = vsyncadd [#allocation8], 4294966528 }
  0x5b   :  { %4286 = dma.done.wait [#allocation11], 1024  }
  0x5c   :  { %4287 = vsyncadd [#allocation11], 4294966272  ;;  %v4297_v1 = vmov 0.0|0.0   ;;  %vm4298_vm0 = vmmov 0   ;;  %v4299_v2 = vmov 0.0   ;;  %v125_v3 = vld [vmem:[#allocation7] sm:$0xff] }
  0x5d   :  { %3862 = vmatprep.subr.bf16.mxu0 %v4297_v1  ;;  %3546 = vmatprep.mubr.msk.f32.mxu0 %vm4298_vm0, %v4299_v2  ;;  %v126_v4 = vld [vmem:[#allocation7 + $0x8] sm:$0xff]  ;;  %v108_v5 = vld [vmem:[#allocation5] sm:$0x3]  ;;  %v312_v9 = vld [vmem:[#allocation5 + $0x4] sm:$0x3]  ;;  %vm134_vm1 = vcmask 130048  }
  0x5e   :  { %3865 = vmatprep.subr.bf16.mxu1 %v4297_v1  ;;  %3553 = vmatprep.mubr.msk.f32.mxu1 %vm4298_vm0, %v4299_v2  ;;  %v4445_v6 = vpack.c.bf16 %v126_v4, %v125_v3  ;;  %v4450_v7 = vld [vmem:[%s4805_s1] ss:$0 sm:$0xff]  ;;  %v516_v12 = vld [vmem:[#allocation5 + $0x8] sm:$0x3]  ;;  %v720_v16 = vld [vmem:[#allocation5 + $0xc] sm:$0x3] }
  0x5f   :  { %v4455_v8 = vld [vmem:[%s4806_s2] ss:$0 sm:$0xff]  ;;  %v116_v10 = vsub.f32 %v108_v5, %v4450_v7  ;;  %v320_v11 = vsub.f32 %v312_v9, %v4450_v7  ;;  %v524_v15 = vsub.f32 %v516_v12, %v4450_v7  ;;  %v728_v18 = vsub.f32 %v720_v16, %v4450_v7  ;;  %v924_v19 = vld [vmem:[#allocation9] sm:$0xff]  ;;  %v925_v20 = vld [vmem:[#allocation9 + $0x8] sm:$0xff]  ;;  %s4301_s26 = smov 96  }
  0x60   :  { %3864 = vmatpush3.bf16.msra.mxu0 %v4445_v6  ;;  %3867 = vmatpush3.bf16.msra.mxu1 %v4445_v6  ;;  %v4483_v22 = vpack.c.bf16 %v925_v20, %v924_v19  ;;  %v926_v23 = vld [vmem:[#allocation9 + $0x10] sm:$0xff]  ;;  %v927_v24 = vld [vmem:[#allocation9 + $0x18] sm:$0xff]  ;;  %v210_v53 = vld [vmem:[#allocation5 + $0x2] sm:$0x3]  ;;  %vm1031_vm2 = vcmask 254976   ;;  %vm928_vm3 = vcmask 261120  }
  0x61   :  { %v124_v13 = vmul.f32 %v4455_v8, %v116_v10  ;;  %3868 = vmatprep.subr.bf16.mxu0 %v4297_v1  ;;  %3871 = vmatprep.subr.bf16.mxu1 %v4297_v1  ;;  %v328_v14 = vmul.f32 %v4455_v8, %v320_v11  ;;  %v532_v17 = vmul.f32 %v4455_v8, %v524_v15  ;;  %v4505_v26 = vld [vmem:[%s4809_s5] ss:$0 sm:$0xff]  ;;  %s4300_s5 = smov 64   ;;  %v414_v54 = vld [vmem:[#allocation5 + $0x6] sm:$0x3]  ;;  %vm3309_vm4 = vcmask 1024  }
  0x62   :  { %v736_v21 = vmul.f32 %v4455_v8, %v728_v18  ;;  %v4488_v25 = vpack.c.bf16 %v927_v24, %v926_v23  ;;  %v218_v55 = vsub.f32 %v210_v53, %v4450_v7  ;;  %v422_v56 = vsub.f32 %v414_v54, %v4450_v7  ;;  %v618_v57 = vld [vmem:[#allocation5 + $0xa] sm:$0x3]  ;;  %v822_v61 = vld [vmem:[#allocation5 + $0xe] sm:$0x3] }
  0x63   :  { %3547 = vmatmul.mubr.msk.f32.vlgmr.msra.gmra.mrb[0].mxu0 %vm134_vm1, %v124_v13  ;;  %v626_v60 = vsub.f32 %v618_v57, %v4450_v7  ;;  %v830_v63 = vsub.f32 %v822_v61, %v4450_v7 }
  0x64   :  { %3870 = vmatpush3.bf16.msra.mxu0 %v4445_v6  ;;  %3560 = vmatprep.mubr.msk.f32.mxu0 %vm4298_vm0, %v4299_v2  ;;  %v226_v58 = vmul.f32 %v4455_v8, %v218_v55  ;;  %v430_v59 = vmul.f32 %v4455_v8, %v422_v56 }
  0x65   :  { %3874 = vmatprep.subr.bf16.mxu0 %v4297_v1  ;;  %v634_v62 = vmul.f32 %v4455_v8, %v626_v60  ;;  %v838_v3 = vmul.f32 %v4455_v8, %v830_v63 }
  0x66   :  { %3554 = vmatmul.mubr.msk.f32.vlgmr.msra.gmra.mrb[0].mxu1 %vm134_vm1, %v226_v58 }
  0x67   :  { %3561 = vmatmul.mubr.msk.f32.vlgmr.msra.gmra.mrb[2].mxu0 %vm134_vm1, %v328_v14  ;;  %3873 = vmatpush3.bf16.msra.mxu1 %v4445_v6 }
  0x68   :  { %3876 = vmatpush3.bf16.msra.mxu0 %v4445_v6  ;;  %3574 = vmatprep.mubr.msk.f32.mxu0 %vm4298_vm0, %v4299_v2 }
  0x69   :  { %3880 = vmatprep.subr.bf16.mxu0 %v4297_v1  ;;  %3567 = vmatprep.mubr.msk.f32.mxu1 %vm4298_vm0, %v4299_v2 }
  0x6a   :  { %3877 = vmatprep.subr.bf16.mxu1 %v4297_v1  ;;  %3568 = vmatmul.mubr.msk.f32.vlgmr.msra.gmra.mrb[2].mxu1 %vm134_vm1, %v430_v59 }
  0x6b   :  { %3575 = vmatmul.mubr.msk.f32.vlgmr.msra.gmra.mrb[4].mxu0 %vm134_vm1, %v532_v17  ;;  %3879 = vmatpush3.bf16.msra.mxu1 %v4445_v6 }
  0x6c   :  { %3882 = vmatpush3.bf16.msra.mxu0 %v4445_v6  ;;  %3588 = vmatprep.mubr.msk.f32.mxu0 %vm4298_vm0, %v4299_v2 }
  0x6d   :  { %3886 = vmatprep.subr.bf16.mxu0 %v4297_v1  ;;  %3581 = vmatprep.mubr.msk.f32.mxu1 %vm4298_vm0, %v4299_v2 }
  0x6e   :  { %3883 = vmatprep.subr.bf16.mxu1 %v4297_v1  ;;  %3582 = vmatmul.mubr.msk.f32.vlgmr.msra.gmra.mrb[4].mxu1 %vm134_vm1, %v634_v62 }
  0x6f   :  { %3589 = vmatmul.mubr.msk.f32.vlgmr.msra.gmra.mrb[6].mxu0 %vm134_vm1, %v736_v21  ;;  %3885 = vmatpush3.bf16.msra.mxu1 %v4445_v6 }
  0x70   :  { %3888 = vmatpush3.bf16.msra.mxu0 %v4483_v22  ;;  %3606 = vmatprep.mubr.msk.f32.mxu0 %vm4298_vm0, %v4299_v2 }
  0x71   :  { %3889 = vmatprep.subr.bf16.mxu0 %v4297_v1  ;;  %3595 = vmatprep.mubr.msk.f32.mxu1 %vm4298_vm0, %v4299_v2 }
  0x72   :  { %3892 = vmatprep.subr.bf16.mxu1 %v4297_v1  ;;  %3596 = vmatmul.mubr.msk.f32.vlgmr.msra.gmra.mrb[6].mxu1 %vm134_vm1, %v838_v3 }
  0x73   :  { %3894 = vmatpush3.bf16.msra.mxu1 %v4483_v22  ;;  %3617 = vmatprep.mubr.msk.f32.mxu1 %vm4298_vm0, %v4299_v2 }
  0x74   :  { %3891 = vmatpush3.bf16.msra.mxu0 %v4488_v25  ;;  %3895 = vmatprep.subr.bf16.mxu1 %v4297_v1 }
  0x75   :  { %3898 = vmatprep.subr.bf16.mxu0 %v4297_v1 }
  0x77   :  { %3607 = vmatmul.mubr.f32.vlgmr.msra.gmra.mrb[8].mxu0 %v4299_v2  ;;  %3897 = vmatpush3.bf16.msra.mxu1 %v4488_v25 }
  0x78   :  { %3900 = vmatpush3.bf16.msra.mxu0 %v4483_v22  ;;  %3628 = vmatprep.mubr.msk.f32.mxu0 %vm4298_vm0, %v4299_v2 }
  0x79   :  { %3901 = vmatprep.subr.bf16.mxu0 %v4297_v1  ;;  %3904 = vmatprep.subr.bf16.mxu1 %v4297_v1 }
  0x7c   :  { %3903 = vmatpush3.bf16.msra.mxu0 %v4488_v25 }
  0x7d   :  { %3910 = vmatprep.subr.bf16.mxu0 %v4297_v1 }
 0x136   :  { %v204_v27 = vpop.f32.mrb[0].mxu0 }
 0x137   :  { %v205_v28 = vadd.f32 %v4505_v26, %v204_v27  ;;  %v3548_v29 = vpop.f32.mrb[1].mxu0 }
 0x139   :  { %208 = vst [vmem:[#allocation3] sm:$0x3] %v205_v28  ;;  %v305_v6 = vpop.f32.mrb[0].mxu1 }
 0x13a   :  { %v407_v30 = vpop.f32.mrb[2].mxu0  ;;  %v306_v7 = vadd.f32 %v4505_v26, %v305_v6  ;;  %v3555_v8 = vpop.f32.mrb[1].mxu1 }
 0x13b   :  { %v408_v31 = vadd.f32 %v4505_v26, %v407_v30  ;;  %v3562_v32 = vpop.f32.mrb[3].mxu0 }
 0x13c   :  { %310 = vst [vmem:[#allocation3 + $0x2] sm:$0x3] %v306_v7 }
 0x13d   :  { %412 = vst [vmem:[#allocation3 + $0x4] sm:$0x3] %v408_v31  ;;  %v509_v9 = vpop.f32.mrb[2].mxu1 }
 0x13e   :  { %v611_v33 = vpop.f32.mrb[4].mxu0  ;;  %v510_v10 = vadd.f32 %v4505_v26, %v509_v9  ;;  %v3569_v11 = vpop.f32.mrb[3].mxu1 }
 0x13f   :  { %v612_v34 = vadd.f32 %v4505_v26, %v611_v33  ;;  %v3576_v35 = vpop.f32.mrb[5].mxu0 }
 0x140   :  { %v923_v39 = vld [vmem:[#allocation3] sm:$0x3]  ;;  %514 = vst [vmem:[#allocation3 + $0x6] sm:$0x3] %v510_v10 }
 0x141   :  { %616 = vst [vmem:[#allocation3 + $0x8] sm:$0x3] %v612_v34  ;;  %v713_v12 = vpop.f32.mrb[4].mxu1 }
 0x142   :  { %v815_v36 = vpop.f32.mrb[6].mxu0  ;;  %v714_v13 = vadd.f32 %v4505_v26, %v713_v12  ;;  %v3583_v14 = vpop.f32.mrb[5].mxu1 }
 0x143   :  { %v816_v37 = vadd.f32 %v4505_v26, %v815_v36  ;;  %v3590_v38 = vpop.f32.mrb[7].mxu0  ;;  %v1033_v19 = vld [vmem:[#allocation3 + $0x2] sm:$0x3] }
 0x144   :  { %718 = vst [vmem:[#allocation3 + $0xa] sm:$0x3] %v714_v13 }
 0x145   :  { %820 = vst [vmem:[#allocation3 + $0xc] sm:$0x3] %v816_v37  ;;  %v917_v15 = vpop.f32.mrb[6].mxu1 }
 0x146   :  { %v918_v16 = vadd.f32 %v4505_v26, %v917_v15  ;;  %v3597_v17 = vpop.f32.mrb[7].mxu1 }
 0x147   :  { %v1249_v57 = vld [vmem:[#allocation3 + $0x6] sm:$0x3] }
 0x148   :  { %922 = vst [vmem:[#allocation3 + $0xe] sm:$0x3] %v918_v16  ;;  %v1357_v13 = vld [vmem:[#allocation3 + $0x8] sm:$0x3] }
 0x14a   :  { %v998_v40 = vpop.f32.mrb[8].mxu0 }
 0x14b   :  { %v1002_v41 = vadd.f32 %v998_v40, %v923_v39  ;;  %v3608_v42 = vpop.f32.mrb[9].mxu0  ;;  %v1141_v39 = vld [vmem:[#allocation3 + $0x4] sm:$0x3] }
 0x14d   :  { %4044 = vtanh.f32 %v1002_v41  ;;  %v3350_v44 = vmul.f32 -1.442695, %v1002_v41 }
 0x14f   :  { %4046 = vpow2.f32 %v3350_v44 }
 0x157   :  { %v4045_v43 = vpop.eup %4044 }
 0x158   :  { %1012 = vrot.lane.b32.xlu0 %v4045_v43, %s4300_s5 }
 0x159   :  { %v4047_v45 = vpop.eup %4046 }
 0x15a   :  { %v1006_v46 = vadd.f32 1.0, %v4047_v45 }
 0x15c   :  { %4048 = vrcp.f32 %v1006_v46 }
 0x166   :  { %v4049_v47 = vpop.eup %4048 }
 0x167   :  { %v1010_v50 = vmul.f32 0.0, %v4049_v47 }
 0x1ca   :  { %v1013_v48 = vpop.permute.xlu0 %1012 }
 0x1cb   :  { %v1015_v49 = vmul.f32 %v4049_v47, %v1013_v48 }
 0x1cd   :  { %1017 = vrot.lane.b32.xlu0 %v1015_v49, %s4293_s6 }
 0x23f   :  { %v1018_v51 = vpop.permute.xlu0 %1017 }
 0x240   :  { %v4513_v52 = vadd.f32 %v1018_v51, %v1010_v50 }
 0x242   :  { %4050 = vtanh.f32 %v4513_v52 }
 0x24c   :  { %v4051_v0 = vpop.eup %4050 }
 0x24d   :  { %1023 = vrot.lane.b32.xlu1 %v4051_v0, %s4300_s5 }
 0x2bf   :  { %v1024_v4 = vpop.permute.xlu1 %1023 }
 0x2c0   :  { %v1026_v5 = vmul.f32 %v4049_v47, %v1024_v4 }
 0x2c2   :  { %1028 = vrot.lane.b32.xlu1 %v1026_v5, %s4293_s6 }
 0x334   :  { %v1029_v18 = vpop.permute.xlu1 %1028 }
 0x335   :  { %1032 = vst.msk [vmem:[#allocation2] sm:$0x3] %vm1031_vm2, %v1029_v18  ;;  %3618 = vmatmul.mubr.msk.f32.vlgmr.msra.gmra.mrb[8].mxu1 %vm928_vm3, %v1029_v18 }
 0x336   :  { %3906 = vmatpush3.bf16.msra.mxu1 %v4483_v22  ;;  %3639 = vmatprep.mubr.msk.f32.mxu1 %vm4298_vm0, %v4299_v2 }
 0x337   :  { %3907 = vmatprep.subr.bf16.mxu1 %v4297_v1 }
 0x33a   :  { %3909 = vmatpush3.bf16.msra.mxu1 %v4488_v25 }
 0x33b   :  { %3916 = vmatprep.subr.bf16.mxu1 %v4297_v1 }
 0x408   :  { %v1106_v20 = vpop.f32.mrb[8].mxu1 }
 0x409   :  { %v1110_v21 = vadd.f32 %v1106_v20, %v1033_v19  ;;  %v3619_v23 = vpop.f32.mrb[9].mxu1 }
 0x40b   :  { %4052 = vtanh.f32 %v1110_v21  ;;  %v3352_v26 = vmul.f32 -1.442695, %v1110_v21 }
 0x40d   :  { %4054 = vpow2.f32 %v3352_v26 }
 0x415   :  { %v4053_v24 = vpop.eup %4052 }
 0x416   :  { %1120 = vrot.lane.b32.xlu0 %v4053_v24, %s4300_s5 }
 0x417   :  { %v4055_v27 = vpop.eup %4054 }
 0x418   :  { %v1114_v28 = vadd.f32 1.0, %v4055_v27 }
 0x41a   :  { %4056 = vrcp.f32 %v1114_v28 }
 0x424   :  { %v4057_v29 = vpop.eup %4056 }
 0x425   :  { %v1118_v32 = vmul.f32 %v4057_v29, %v4513_v52 }
 0x488   :  { %v1121_v30 = vpop.permute.xlu0 %1120 }
 0x489   :  { %v1123_v31 = vmul.f32 %v4057_v29, %v1121_v30 }
 0x48b   :  { %1125 = vrot.lane.b32.xlu1 %v1123_v31, %s4293_s6 }
 0x4fd   :  { %v1126_v33 = vpop.permute.xlu1 %1125 }
 0x4fe   :  { %v1128_v34 = vadd.f32 %v1126_v33, %v1118_v32  ;;  %v1465_v33 = vld [vmem:[#allocation3 + $0xa] sm:$0x3] }
 0x500   :  { %4058 = vtanh.f32 %v1128_v34 }
 0x50a   :  { %v4059_v35 = vpop.eup %4058 }
 0x50b   :  { %1131 = vrot.lane.b32.xlu0 %v4059_v35, %s4300_s5 }
 0x57d   :  { %v1132_v36 = vpop.permute.xlu0 %1131 }
 0x57e   :  { %v1134_v37 = vmul.f32 %v4057_v29, %v1132_v36 }
 0x580   :  { %1136 = vrot.lane.b32.xlu1 %v1134_v37, %s4293_s6 }
 0x5f2   :  { %v1137_v38 = vpop.permute.xlu1 %1136 }
 0x5f3   :  { %1140 = vst.msk [vmem:[#allocation2 + $0x2] sm:$0x3] %vm1031_vm2, %v1137_v38  ;;  %3629 = vmatmul.mubr.msk.f32.vlgmr.msra.gmra.mrb[10].mxu0 %vm928_vm3, %v1137_v38 }
 0x5f4   :  { %3912 = vmatpush3.bf16.msra.mxu0 %v4483_v22  ;;  %3650 = vmatprep.mubr.msk.f32.mxu0 %vm4298_vm0, %v4299_v2 }
 0x5f5   :  { %3913 = vmatprep.subr.bf16.mxu0 %v4297_v1 }
 0x5f8   :  { %3915 = vmatpush3.bf16.msra.mxu0 %v4488_v25 }
 0x5f9   :  { %3922 = vmatprep.subr.bf16.mxu0 %v4297_v1 }
 0x6c6   :  { %v1214_v40 = vpop.f32.mrb[10].mxu0 }
 0x6c7   :  { %v1218_v41 = vadd.f32 %v1214_v40, %v1141_v39  ;;  %v3630_v42 = vpop.f32.mrb[11].mxu0 }
 0x6c9   :  { %4060 = vtanh.f32 %v1218_v41  ;;  %v3354_v44 = vmul.f32 -1.442695, %v1218_v41 }
 0x6cb   :  { %4062 = vpow2.f32 %v3354_v44 }
 0x6d3   :  { %v4061_v43 = vpop.eup %4060 }
 0x6d4   :  { %1228 = vrot.lane.b32.xlu0 %v4061_v43, %s4300_s5 }
 0x6d5   :  { %v4063_v45 = vpop.eup %4062 }
 0x6d6   :  { %v1222_v46 = vadd.f32 1.0, %v4063_v45 }
 0x6d8   :  { %4064 = vrcp.f32 %v1222_v46 }
 0x6e2   :  { %v4065_v47 = vpop.eup %4064 }
 0x6e3   :  { %v1226_v50 = vmul.f32 %v4065_v47, %v1128_v34 }
 0x746   :  { %v1229_v48 = vpop.permute.xlu0 %1228 }
 0x747   :  { %v1231_v49 = vmul.f32 %v4065_v47, %v1229_v48  ;;  %v1790_v48 = vld [vmem:[#allocation10] sm:$0xff] }
 0x749   :  { %1233 = vrot.lane.b32.xlu1 %v1231_v49, %s4293_s6  ;;  %v1791_v49 = vld [vmem:[#allocation10 + $0x8] sm:$0xff] }
 0x7bb   :  { %v1234_v51 = vpop.permute.xlu1 %1233 }
 0x7bc   :  { %v1236_v52 = vadd.f32 %v1234_v51, %v1226_v50  ;;  %v4616_v50 = vpack.c.bf16 %v1791_v49, %v1790_v48  ;;  %v1792_v51 = vld [vmem:[#allocation10 + $0x10] sm:$0xff] }
 0x7be   :  { %4066 = vtanh.f32 %v1236_v52 }
 0x7c8   :  { %v4067_v53 = vpop.eup %4066 }
 0x7c9   :  { %1239 = vrot.lane.b32.xlu0 %v4067_v53, %s4300_s5 }
 0x83b   :  { %v1240_v54 = vpop.permute.xlu0 %1239 }
 0x83c   :  { %v1242_v55 = vmul.f32 %v4065_v47, %v1240_v54 }
 0x83e   :  { %1244 = vrot.lane.b32.xlu1 %v1242_v55, %s4293_s6  ;;  %v1789_v55 = vld [vmem:[#allocation2] sm:$0x3] }
 0x8b0   :  { %v1245_v56 = vpop.permute.xlu1 %1244 }
 0x8b1   :  { %1248 = vst.msk [vmem:[#allocation2 + $0x4] sm:$0x3] %vm1031_vm2, %v1245_v56  ;;  %3640 = vmatmul.mubr.msk.f32.vlgmr.msra.gmra.mrb[10].mxu1 %vm928_vm3, %v1245_v56 }
 0x8b2   :  { %3918 = vmatpush3.bf16.msra.mxu1 %v4483_v22  ;;  %3661 = vmatprep.mubr.msk.f32.mxu1 %vm4298_vm0, %v4299_v2 }
 0x8b3   :  { %3919 = vmatprep.subr.bf16.mxu1 %v4297_v1 }
 0x8b6   :  { %3921 = vmatpush3.bf16.msra.mxu1 %v4488_v25 }
 0x8b7   :  { %3928 = vmatprep.subr.bf16.mxu1 %v4297_v1 }
 0x8b8   :  { %v1961_v56 = vld [vmem:[#allocation2 + $0x4] sm:$0x3] }
 0x984   :  { %v1322_v58 = vpop.f32.mrb[10].mxu1 }
 0x985   :  { %v1326_v59 = vadd.f32 %v1322_v58, %v1249_v57  ;;  %v3641_v60 = vpop.f32.mrb[11].mxu1  ;;  %v1573_v58 = vld [vmem:[#allocation3 + $0xc] sm:$0x3] }
 0x987   :  { %4068 = vtanh.f32 %v1326_v59  ;;  %v3356_v62 = vmul.f32 -1.442695, %v1326_v59 }
 0x989   :  { %4070 = vpow2.f32 %v3356_v62  ;;  %v4652_v62 = vld [vmem:[%s4812_s8] ss:$0 sm:$0xff] }
 0x991   :  { %v4069_v61 = vpop.eup %4068 }
 0x992   :  { %1336 = vrot.lane.b32.xlu0 %v4069_v61, %s4300_s5 }
 0x993   :  { %v4071_v63 = vpop.eup %4070 }
 0x994   :  { %v1330_v0 = vadd.f32 1.0, %v4071_v63 }
 0x996   :  { %4072 = vrcp.f32 %v1330_v0 }
 0x9a0   :  { %v4073_v3 = vpop.eup %4072 }
 0x9a1   :  { %v1334_v6 = vmul.f32 %v4073_v3, %v1236_v52  ;;  %v1793_v52 = vld [vmem:[#allocation10 + $0x18] sm:$0xff] }
 0x9a2   :  { %v4621_v54 = vpack.c.bf16 %v1793_v52, %v1792_v51 }
 0xa04   :  { %v1337_v4 = vpop.permute.xlu0 %1336 }
 0xa05   :  { %v1339_v5 = vmul.f32 %v4073_v3, %v1337_v4 }
 0xa07   :  { %1341 = vrot.lane.b32.xlu1 %v1339_v5, %s4293_s6 }
 0xa79   :  { %v1342_v7 = vpop.permute.xlu1 %1341 }
 0xa7a   :  { %v1344_v8 = vadd.f32 %v1342_v7, %v1334_v6 }
 0xa7c   :  { %4074 = vtanh.f32 %v1344_v8 }
 0xa86   :  { %v4075_v9 = vpop.eup %4074 }
 0xa87   :  { %1347 = vrot.lane.b32.xlu0 %v4075_v9, %s4300_s5 }
 0xaf9   :  { %v1348_v10 = vpop.permute.xlu0 %1347 }
 0xafa   :  { %v1350_v11 = vmul.f32 %v4073_v3, %v1348_v10 }
 0xafc   :  { %1352 = vrot.lane.b32.xlu1 %v1350_v11, %s4293_s6 }
 0xb6e   :  { %v1353_v12 = vpop.permute.xlu1 %1352 }
 0xb6f   :  { %1356 = vst.msk [vmem:[#allocation2 + $0x6] sm:$0x3] %vm1031_vm2, %v1353_v12  ;;  %3651 = vmatmul.mubr.msk.f32.vlgmr.msra.gmra.mrb[12].mxu0 %vm928_vm3, %v1353_v12 }
 0xb70   :  { %3924 = vmatpush3.bf16.msra.mxu0 %v4483_v22  ;;  %3672 = vmatprep.mubr.msk.f32.mxu0 %vm4298_vm0, %v4299_v2 }
 0xb71   :  { %3925 = vmatprep.subr.bf16.mxu0 %v4297_v1 }
 0xb74   :  { %3927 = vmatpush3.bf16.msra.mxu0 %v4488_v25 }
 0xb75   :  { %3934 = vmatprep.subr.bf16.mxu0 %v4297_v1 }
 0xc42   :  { %v1430_v14 = vpop.f32.mrb[12].mxu0 }
 0xc43   :  { %v1434_v15 = vadd.f32 %v1430_v14, %v1357_v13  ;;  %v3652_v16 = vpop.f32.mrb[13].mxu0 }
 0xc45   :  { %4076 = vtanh.f32 %v1434_v15  ;;  %v3358_v18 = vmul.f32 -1.442695, %v1434_v15 }
 0xc47   :  { %4078 = vpow2.f32 %v3358_v18 }
 0xc4f   :  { %v4077_v17 = vpop.eup %4076 }
 0xc50   :  { %1444 = vrot.lane.b32.xlu0 %v4077_v17, %s4300_s5 }
 0xc51   :  { %v4079_v19 = vpop.eup %4078 }
 0xc52   :  { %v1438_v20 = vadd.f32 1.0, %v4079_v19 }
 0xc54   :  { %4080 = vrcp.f32 %v1438_v20 }
 0xc5e   :  { %v4081_v21 = vpop.eup %4080 }
 0xc5f   :  { %v1442_v26 = vmul.f32 %v4081_v21, %v1344_v8 }
 0xcc2   :  { %v1445_v23 = vpop.permute.xlu0 %1444 }
 0xcc3   :  { %v1447_v24 = vmul.f32 %v4081_v21, %v1445_v23 }
 0xcc5   :  { %1449 = vrot.lane.b32.xlu1 %v1447_v24, %s4293_s6 }
 0xd37   :  { %v1450_v27 = vpop.permute.xlu1 %1449 }
 0xd38   :  { %v1452_v28 = vadd.f32 %v1450_v27, %v1442_v26  ;;  %v2478_v26 = vld [vmem:[#allocation12] sm:$0xff]  ;;  %v2479_v27 = vld [vmem:[#allocation12 + $0x8] sm:$0xff] }
 0xd3a   :  { %4082 = vtanh.f32 %v1452_v28 }
 0xd44   :  { %v4083_v29 = vpop.eup %4082 }
 0xd45   :  { %1455 = vrot.lane.b32.xlu0 %v4083_v29, %s4300_s5  ;;  %v2480_v29 = vld [vmem:[#allocation12 + $0x10] sm:$0xff] }
 0xdb7   :  { %v1456_v30 = vpop.permute.xlu0 %1455 }
 0xdb8   :  { %v1458_v31 = vmul.f32 %v4081_v21, %v1456_v30  ;;  %v2481_v30 = vld [vmem:[#allocation12 + $0x18] sm:$0xff] }
 0xdba   :  { %1460 = vrot.lane.b32.xlu1 %v1458_v31, %s4293_s6  ;;  %v1875_v31 = vld [vmem:[#allocation2 + $0x2] sm:$0x3] }
 0xe2c   :  { %v1461_v32 = vpop.permute.xlu1 %1460 }
 0xe2d   :  { %1464 = vst.msk [vmem:[#allocation2 + $0x8] sm:$0x3] %vm1031_vm2, %v1461_v32  ;;  %3662 = vmatmul.mubr.msk.f32.vlgmr.msra.gmra.mrb[12].mxu1 %vm928_vm3, %v1461_v32 }
 0xe2e   :  { %3930 = vmatpush3.bf16.msra.mxu1 %v4483_v22  ;;  %3683 = vmatprep.mubr.msk.f32.mxu1 %vm4298_vm0, %v4299_v2 }
 0xe2f   :  { %3931 = vmatprep.subr.bf16.mxu1 %v4297_v1 }
 0xe32   :  { %3933 = vmatpush3.bf16.msra.mxu1 %v4488_v25 }
 0xe33   :  { %3940 = vmatprep.subr.bf16.mxu1 %v4297_v1 }
 0xe34   :  { %v2133_v57 = vld [vmem:[#allocation2 + $0x8] sm:$0x3] }
 0xf00   :  { %v1538_v34 = vpop.f32.mrb[12].mxu1 }
 0xf01   :  { %v1542_v35 = vadd.f32 %v1538_v34, %v1465_v33  ;;  %v3663_v36 = vpop.f32.mrb[13].mxu1  ;;  %v4679_v33 = vpack.c.bf16 %v2481_v30, %v2480_v29  ;;  %v2047_v34 = vld [vmem:[#allocation2 + $0x6] sm:$0x3] }
 0xf02   :  { %v1681_v36 = vld [vmem:[#allocation3 + $0xe] sm:$0x3] }
 0xf03   :  { %4084 = vtanh.f32 %v1542_v35  ;;  %v3360_v38 = vmul.f32 -1.442695, %v1542_v35 }
 0xf05   :  { %4086 = vpow2.f32 %v3360_v38 }
 0xf0d   :  { %v4085_v37 = vpop.eup %4084 }
 0xf0e   :  { %1552 = vrot.lane.b32.xlu0 %v4085_v37, %s4300_s5 }
 0xf0f   :  { %v4087_v22 = vpop.eup %4086 }
 0xf10   :  { %v1546_v39 = vadd.f32 1.0, %v4087_v22 }
 0xf12   :  { %4088 = vrcp.f32 %v1546_v39 }
 0xf1c   :  { %v4089_v40 = vpop.eup %4088 }
 0xf1d   :  { %v1550_v25 = vmul.f32 %v4089_v40, %v1452_v28  ;;  %v4672_v28 = vpack.c.bf16 %v2479_v27, %v2478_v26 }
 0xf80   :  { %v1553_v41 = vpop.permute.xlu0 %1552 }
 0xf81   :  { %v1555_v42 = vmul.f32 %v4089_v40, %v1553_v41 }
 0xf83   :  { %1557 = vrot.lane.b32.xlu1 %v1555_v42, %s4293_s6 }
 0xff5   :  { %v1558_v43 = vpop.permute.xlu1 %1557 }
 0xff6   :  { %v4611_v44 = vadd.f32 %v1558_v43, %v1550_v25 }
 0xff8   :  { %4090 = vtanh.f32 %v4611_v44 }
0x1002   :  { %v4091_v45 = vpop.eup %4090 }
0x1003   :  { %1563 = vrot.lane.b32.xlu0 %v4091_v45, %s4300_s5 }
0x1075   :  { %v1564_v46 = vpop.permute.xlu0 %1563 }
0x1076   :  { %v1566_v47 = vmul.f32 %v4089_v40, %v1564_v46 }
0x1078   :  { %1568 = vrot.lane.b32.xlu1 %v1566_v47, %s4293_s6 }
0x10ea   :  { %v1569_v53 = vpop.permute.xlu1 %1568 }
0x10eb   :  { %1572 = vst.msk [vmem:[#allocation2 + $0xa] sm:$0x3] %vm1031_vm2, %v1569_v53  ;;  %3673 = vmatmul.mubr.msk.f32.vlgmr.msra.gmra.mrb[14].mxu0 %vm928_vm3, %v1569_v53 }
0x10ec   :  { %3936 = vmatpush3.bf16.msra.mxu0 %v4616_v50  ;;  %3694 = vmatprep.mubr.msk.f32.mxu0 %vm4298_vm0, %v4299_v2 }
0x10ed   :  { %3937 = vmatprep.subr.bf16.mxu0 %v4297_v1 }
0x10f0   :  { %3939 = vmatpush3.bf16.msra.mxu0 %v4621_v54 }
0x10f1   :  { %3946 = vmatprep.subr.bf16.mxu0 %v4297_v1 }
0x10f2   :  { %v2219_v35 = vld [vmem:[#allocation2 + $0xa] sm:$0x3] }
0x10f3   :  { %3695 = vmatmul.mubr.msk.f32.vlgmr.msra.gmra.mrb[16].mxu0 %vm928_vm3, %v1789_v55 }
0x10f4   :  { %3948 = vmatpush3.bf16.msra.mxu0 %v4616_v50  ;;  %3716 = vmatprep.mubr.msk.f32.mxu0 %vm4298_vm0, %v4299_v2 }
0x10f5   :  { %3949 = vmatprep.subr.bf16.mxu0 %v4297_v1 }
0x10f8   :  { %3951 = vmatpush3.bf16.msra.mxu0 %v4621_v54 }
0x10f9   :  { %3958 = vmatprep.subr.bf16.mxu0 %v4297_v1 }
0x10fb   :  { %3717 = vmatmul.mubr.msk.f32.vlgmr.msra.gmra.mrb[18].mxu0 %vm928_vm3, %v1961_v56 }
0x10fc   :  { %3960 = vmatpush3.bf16.msra.mxu0 %v4616_v50  ;;  %3738 = vmatprep.mubr.msk.f32.mxu0 %vm4298_vm0, %v4299_v2 }
0x10fd   :  { %3961 = vmatprep.subr.bf16.mxu0 %v4297_v1 }
0x1100   :  { %3963 = vmatpush3.bf16.msra.mxu0 %v4621_v54 }
0x1101   :  { %3970 = vmatprep.subr.bf16.mxu0 %v4297_v1 }
0x1103   :  { %3739 = vmatmul.mubr.msk.f32.vlgmr.msra.gmra.mrb[20].mxu0 %vm928_vm3, %v2133_v57 }
0x1104   :  { %3972 = vmatpush3.bf16.msra.mxu0 %v4616_v50  ;;  %3760 = vmatprep.mubr.msk.f32.mxu0 %vm4298_vm0, %v4299_v2 }
0x1105   :  { %3973 = vmatprep.subr.bf16.mxu0 %v4297_v1 }
0x1108   :  { %3975 = vmatpush3.bf16.msra.mxu0 %v4621_v54 }
0x1109   :  { %3982 = vmatprep.subr.bf16.mxu0 %v4297_v1 }
0x11be   :  { %v1646_v59 = vpop.f32.mrb[14].mxu0 }
0x11bf   :  { %v1650_v60 = vadd.f32 %v1646_v59, %v1573_v58  ;;  %v3674_v61 = vpop.f32.mrb[15].mxu0 }
0x11c1   :  { %4092 = vtanh.f32 %v1650_v60  ;;  %v3362_v11 = vmul.f32 -1.442695, %v1650_v60 }
0x11c3   :  { %4094 = vpow2.f32 %v3362_v11 }
0x11c6   :  { %v1870_v63 = vpop.f32.mrb[16].mxu0 }
0x11c7   :  { %v1871_v0 = vadd.f32 %v4652_v62, %v1870_v63  ;;  %v3696_v3 = vpop.f32.mrb[17].mxu0 }
0x11c9   :  { %1874 = vst [vmem:[#allocation3] sm:$0x3] %v1871_v0 }
0x11cb   :  { %v4093_v4 = vpop.eup %4092 }
0x11cc   :  { %1660 = vrot.lane.b32.xlu0 %v4093_v4, %s4300_s5 }
0x11cd   :  { %v4095_v12 = vpop.eup %4094 }
0x11ce   :  { %v2042_v5 = vpop.f32.mrb[18].mxu0  ;;  %v1654_v13 = vadd.f32 1.0, %v4095_v12 }
0x11cf   :  { %v2043_v6 = vadd.f32 %v4652_v62, %v2042_v5  ;;  %v3718_v7 = vpop.f32.mrb[19].mxu0 }
0x11d0   :  { %4096 = vrcp.f32 %v1654_v13  ;;  %v2477_v46 = vld [vmem:[#allocation3] sm:$0x3] }
0x11d1   :  { %2046 = vst [vmem:[#allocation3 + $0x4] sm:$0x3] %v2043_v6 }
0x11d6   :  { %v2214_v8 = vpop.f32.mrb[20].mxu0 }
0x11d7   :  { %v2215_v9 = vadd.f32 %v4652_v62, %v2214_v8  ;;  %v3740_v10 = vpop.f32.mrb[21].mxu0 }
0x11d9   :  { %2218 = vst [vmem:[#allocation3 + $0x8] sm:$0x3] %v2215_v9 }
0x11da   :  { %v4097_v14 = vpop.eup %4096 }
0x11db   :  { %v1658_v17 = vmul.f32 %v4097_v14, %v4611_v44 }
0x123e   :  { %v1661_v15 = vpop.permute.xlu0 %1660 }
0x123f   :  { %v1663_v16 = vmul.f32 %v4097_v14, %v1661_v15 }
0x1241   :  { %1665 = vrot.lane.b32.xlu1 %v1663_v16, %s4293_s6 }
0x12b3   :  { %v1666_v18 = vpop.permute.xlu1 %1665 }
0x12b4   :  { %v4660_v19 = vadd.f32 %v1666_v18, %v1658_v17 }
0x12b6   :  { %4098 = vtanh.f32 %v4660_v19 }
0x12c0   :  { %v4099_v20 = vpop.eup %4098 }
0x12c1   :  { %1671 = vrot.lane.b32.xlu0 %v4099_v20, %s4300_s5 }
0x1333   :  { %v1672_v21 = vpop.permute.xlu0 %1671 }
0x1334   :  { %v1674_v23 = vmul.f32 %v4097_v14, %v1672_v21 }
0x1336   :  { %1676 = vrot.lane.b32.xlu1 %v1674_v23, %s4293_s6 }
0x13a8   :  { %v1677_v24 = vpop.permute.xlu1 %1676 }
0x13a9   :  { %1680 = vst.msk [vmem:[#allocation2 + $0xc] sm:$0x3] %vm1031_vm2, %v1677_v24  ;;  %3684 = vmatmul.mubr.msk.f32.vlgmr.msra.gmra.mrb[14].mxu1 %vm928_vm3, %v1677_v24 }
0x13aa   :  { %3942 = vmatpush3.bf16.msra.mxu1 %v4616_v50  ;;  %3705 = vmatprep.mubr.msk.f32.mxu1 %vm4298_vm0, %v4299_v2 }
0x13ab   :  { %3943 = vmatprep.subr.bf16.mxu1 %v4297_v1 }
0x13ae   :  { %3945 = vmatpush3.bf16.msra.mxu1 %v4621_v54 }
0x13af   :  { %3952 = vmatprep.subr.bf16.mxu1 %v4297_v1 }
0x13b0   :  { %v2305_v32 = vld [vmem:[#allocation2 + $0xc] sm:$0x3] }
0x13b1   :  { %3706 = vmatmul.mubr.msk.f32.vlgmr.msra.gmra.mrb[16].mxu1 %vm928_vm3, %v1875_v31  ;;  %3761 = vmatmul.mubr.msk.f32.vlgmr.msra.gmra.mrb[22].mxu0 %vm928_vm3, %v2305_v32 }
0x13b2   :  { %3954 = vmatpush3.bf16.msra.mxu1 %v4616_v50  ;;  %3984 = vmatpush3.bf16.msra.mxu0 %v4672_v28 }
0x13b3   :  { %3955 = vmatprep.subr.bf16.mxu1 %v4297_v1  ;;  %3985 = vmatprep.subr.bf16.mxu0 %v4297_v1 }
0x13b4   :  { %3727 = vmatprep.mubr.msk.f32.mxu1 %vm4298_vm0, %v4299_v2  ;;  %3782 = vmatprep.mubr.msk.f32.mxu0 %vm4298_vm0, %v4299_v2 }
0x13b6   :  { %3957 = vmatpush3.bf16.msra.mxu1 %v4621_v54  ;;  %3987 = vmatpush3.bf16.msra.mxu0 %v4679_v33 }
0x13b7   :  { %3964 = vmatprep.subr.bf16.mxu1 %v4297_v1  ;;  %3994 = vmatprep.subr.bf16.mxu0 %v4297_v1 }
0x13b9   :  { %3728 = vmatmul.mubr.msk.f32.vlgmr.msra.gmra.mrb[18].mxu1 %vm928_vm3, %v2047_v34  ;;  %3783 = vmatmul.mubr.f32.vlgmr.msra.gmra.mrb[24].mxu0 %v4299_v2 }
0x13ba   :  { %3966 = vmatpush3.bf16.msra.mxu1 %v4616_v50  ;;  %3749 = vmatprep.mubr.msk.f32.mxu1 %vm4298_vm0, %v4299_v2 }
0x13bb   :  { %3967 = vmatprep.subr.bf16.mxu1 %v4297_v1  ;;  %3996 = vmatpush3.bf16.msra.mxu0 %v4672_v28 }
0x13bc   :  { %3997 = vmatprep.subr.bf16.mxu0 %v4297_v1  ;;  %3804 = vmatprep.mubr.msk.f32.mxu0 %vm4298_vm0, %v4299_v2 }
0x13be   :  { %3969 = vmatpush3.bf16.msra.mxu1 %v4621_v54 }
0x13bf   :  { %3976 = vmatprep.subr.bf16.mxu1 %v4297_v1  ;;  %3999 = vmatpush3.bf16.msra.mxu0 %v4679_v33 }
0x13c0   :  { %4006 = vmatprep.subr.bf16.mxu0 %v4297_v1 }
0x13c1   :  { %3750 = vmatmul.mubr.msk.f32.vlgmr.msra.gmra.mrb[20].mxu1 %vm928_vm3, %v2219_v35 }
0x13c2   :  { %3978 = vmatpush3.bf16.msra.mxu1 %v4616_v50  ;;  %3771 = vmatprep.mubr.msk.f32.mxu1 %vm4298_vm0, %v4299_v2 }
0x13c3   :  { %3979 = vmatprep.subr.bf16.mxu1 %v4297_v1 }
0x13c6   :  { %3981 = vmatpush3.bf16.msra.mxu1 %v4621_v54 }
0x13c7   :  { %3988 = vmatprep.subr.bf16.mxu1 %v4297_v1 }
0x147c   :  { %v1754_v37 = vpop.f32.mrb[14].mxu1 }
0x147d   :  { %v1758_v38 = vadd.f32 %v1754_v37, %v1681_v36  ;;  %v3685_v22 = vpop.f32.mrb[15].mxu1 }
0x147f   :  { %4100 = vtanh.f32 %v1758_v38  ;;  %v3364_v56 = vmul.f32 -1.442695, %v1758_v38 }
0x1484   :  { %v1956_v39 = vpop.f32.mrb[16].mxu1  ;;  %v2386_v40 = vpop.f32.mrb[22].mxu0 }
0x1485   :  { %v1957_v41 = vadd.f32 %v4652_v62, %v1956_v39  ;;  %v3707_v42 = vpop.f32.mrb[17].mxu1  ;;  %v2387_v25 = vadd.f32 %v4652_v62, %v2386_v40  ;;  %v3762_v43 = vpop.f32.mrb[23].mxu0 }
0x1487   :  { %1960 = vst [vmem:[#allocation3 + $0x2] sm:$0x3] %v1957_v41  ;;  %2390 = vst [vmem:[#allocation3 + $0xc] sm:$0x3] %v2387_v25 }
0x1489   :  { %v4101_v44 = vpop.eup %4100 }
0x148a   :  { %1768 = vrot.lane.b32.xlu0 %v4101_v44, %s4300_s5  ;;  %v2678_v44 = vld [vmem:[#allocation3 + $0x4] sm:$0x3] }
0x148c   :  { %v2128_v45 = vpop.f32.mrb[18].mxu1  ;;  %v2548_v47 = vpop.f32.mrb[24].mxu0 }
0x148d   :  { %v2129_v48 = vadd.f32 %v4652_v62, %v2128_v45  ;;  %v2552_v49 = vadd.f32 %v2548_v47, %v2477_v46  ;;  %v3729_v50 = vpop.f32.mrb[19].mxu1  ;;  %v3784_v51 = vpop.f32.mrb[25].mxu0 }
0x148e   :  { %v2577_v27 = vld [vmem:[#allocation3 + $0x2] sm:$0x3] }
0x148f   :  { %2132 = vst [vmem:[#allocation3 + $0x6] sm:$0x3] %v2129_v48  ;;  %4102 = vtanh.f32 %v2552_v49  ;;  %v3381_v58 = vmul.f32 -1.442695, %v2552_v49 }
0x1490   :  { %4104 = vpow2.f32 %v3364_v56 }
0x1491   :  { %4106 = vpow2.f32 %v3381_v58 }
0x1494   :  { %v2300_v52 = vpop.f32.mrb[20].mxu1 }
0x1495   :  { %v2301_v53 = vadd.f32 %v4652_v62, %v2300_v52  ;;  %v3751_v54 = vpop.f32.mrb[21].mxu1 }
0x1497   :  { %2304 = vst [vmem:[#allocation3 + $0xa] sm:$0x3] %v2301_v53 }
0x1499   :  { %v4103_v55 = vpop.eup %4102 }
0x149a   :  { %2562 = vrot.lane.b32.xlu1 %v4103_v55, %s4300_s5  ;;  %v4105_v57 = vpop.eup %4104 }
0x149b   :  { %v1762_v59 = vadd.f32 1.0, %v4105_v57  ;;  %v4107_v60 = vpop.eup %4106 }
0x149c   :  { %v2556_v3 = vadd.f32 1.0, %v4107_v60 }
0x149d   :  { %4108 = vrcp.f32 %v1762_v59 }
0x149e   :  { %4110 = vrcp.f32 %v2556_v3 }
0x14a7   :  { %v4109_v61 = vpop.eup %4108 }
0x14a8   :  { %v4111_v4 = vpop.eup %4110  ;;  %v1766_v7 = vmul.f32 %v4109_v61, %v4660_v19 }
0x14a9   :  { %v2560_v11 = vmul.f32 0.0, %v4111_v4 }
0x14fc   :  { %v1769_v63 = vpop.permute.xlu0 %1768 }
0x14fd   :  { %v1771_v0 = vmul.f32 %v4109_v61, %v1769_v63  ;;  %v2779_v63 = vld [vmem:[#allocation3 + $0x6] sm:$0x3] }
0x14ff   :  { %1773 = vrot.lane.b32.xlu0 %v1771_v0, %s4293_s6 }
0x150c   :  { %v2563_v5 = vpop.permute.xlu1 %2562 }
0x150d   :  { %v2565_v6 = vmul.f32 %v4111_v4, %v2563_v5 }
0x150f   :  { %2567 = vrot.lane.b32.xlu1 %v2565_v6, %s4293_s6 }
0x1571   :  { %v1774_v8 = vpop.permute.xlu0 %1773 }
0x1572   :  { %v1776_v9 = vadd.f32 %v1774_v8, %v1766_v7 }
0x1574   :  { %4112 = vtanh.f32 %v1776_v9 }
0x157e   :  { %v4113_v10 = vpop.eup %4112 }
0x157f   :  { %1779 = vrot.lane.b32.xlu0 %v4113_v10, %s4300_s5 }
0x1581   :  { %v2568_v12 = vpop.permute.xlu1 %2567 }
0x1582   :  { %v2570_v13 = vadd.f32 %v2568_v12, %v2560_v11 }
0x1584   :  { %4114 = vtanh.f32 %v2570_v13 }
0x158e   :  { %v4115_v14 = vpop.eup %4114 }
0x158f   :  { %2573 = vrot.lane.b32.xlu1 %v4115_v14, %s4300_s5 }
0x15f1   :  { %v1780_v15 = vpop.permute.xlu0 %1779 }
0x15f2   :  { %v1782_v16 = vmul.f32 %v4109_v61, %v1780_v15 }
0x15f4   :  { %1784 = vrot.lane.b32.xlu0 %v1782_v16, %s4293_s6 }
0x1601   :  { %v2574_v17 = vpop.permute.xlu1 %2573 }
0x1602   :  { %v2576_v18 = vmul.f32 %v4111_v4, %v2574_v17 }
0x1604   :  { %2579 = vrot.lane.b32.xlu1 %v2576_v18, %s4293_s6 }
0x1666   :  { %v1785_v19 = vpop.permute.xlu0 %1784 }
0x1667   :  { %1788 = vst.msk [vmem:[#allocation2 + $0xe] sm:$0x3] %vm1031_vm2, %v1785_v19  ;;  %v2880_v19 = vld [vmem:[#allocation3 + $0x8] sm:$0x3] }
0x166e   :  { %v2391_v20 = vld [vmem:[#allocation2 + $0xe] sm:$0x3] }
0x166f   :  { %3772 = vmatmul.mubr.msk.f32.vlgmr.msra.gmra.mrb[22].mxu1 %vm928_vm3, %v2391_v20 }
0x1670   :  { %3990 = vmatpush3.bf16.msra.mxu1 %v4672_v28  ;;  %3793 = vmatprep.mubr.msk.f32.mxu1 %vm4298_vm0, %v4299_v2 }
0x1671   :  { %3991 = vmatprep.subr.bf16.mxu1 %v4297_v1 }
0x1674   :  { %3993 = vmatpush3.bf16.msra.mxu1 %v4679_v33 }
0x1675   :  { %4000 = vmatprep.subr.bf16.mxu1 %v4297_v1 }
0x1676   :  { %v2580_v21 = vpop.permute.xlu1 %2579 }
0x1677   :  { %3794 = vmatmul.mubr.msk.f32.vlgmr.msra.gmra.mrb[24].mxu1 %vm928_vm3, %v2580_v21 }
0x1678   :  { %4002 = vmatpush3.bf16.msra.mxu1 %v4672_v28  ;;  %3815 = vmatprep.mubr.msk.f32.mxu1 %vm4298_vm0, %v4299_v2 }
0x1679   :  { %4003 = vmatprep.subr.bf16.mxu1 %v4297_v1 }
0x167c   :  { %4005 = vmatpush3.bf16.msra.mxu1 %v4679_v33 }
0x167d   :  { %4012 = vmatprep.subr.bf16.mxu1 %v4297_v1 }
0x1742   :  { %v2472_v23 = vpop.f32.mrb[22].mxu1 }
0x1743   :  { %v2473_v24 = vadd.f32 %v4652_v62, %v2472_v23  ;;  %v3773_v26 = vpop.f32.mrb[23].mxu1 }
0x1745   :  { %2476 = vst [vmem:[#allocation3 + $0xe] sm:$0x3] %v2473_v24 }
0x174a   :  { %v2649_v29 = vpop.f32.mrb[24].mxu1 }
0x174b   :  { %v2653_v30 = vadd.f32 %v2649_v29, %v2577_v27  ;;  %v3795_v31 = vpop.f32.mrb[25].mxu1 }
0x174d   :  { %4116 = vtanh.f32 %v2653_v30  ;;  %v3383_v34 = vmul.f32 -1.442695, %v2653_v30 }
0x174f   :  { %4118 = vpow2.f32 %v3383_v34 }
0x1757   :  { %v4117_v32 = vpop.eup %4116 }
0x1758   :  { %2663 = vrot.lane.b32.xlu0 %v4117_v32, %s4300_s5 }
0x1759   :  { %v4119_v35 = vpop.eup %4118 }
0x175a   :  { %v2657_v36 = vadd.f32 1.0, %v4119_v35 }
0x175c   :  { %4120 = vrcp.f32 %v2657_v36 }
0x1766   :  { %v4121_v37 = vpop.eup %4120 }
0x1767   :  { %v2661_v62 = vmul.f32 %v4121_v37, %v2570_v13 }
0x17ca   :  { %v2664_v38 = vpop.permute.xlu0 %2663 }
0x17cb   :  { %v2666_v22 = vmul.f32 %v4121_v37, %v2664_v38 }
0x17cd   :  { %2668 = vrot.lane.b32.xlu1 %v2666_v22, %s4293_s6 }
0x183f   :  { %v2669_v39 = vpop.permute.xlu1 %2668 }
0x1840   :  { %v2671_v40 = vadd.f32 %v2669_v39, %v2661_v62  ;;  %v2981_v39 = vld [vmem:[#allocation3 + $0xa] sm:$0x3] }
0x1842   :  { %4122 = vtanh.f32 %v2671_v40 }
0x184c   :  { %v4123_v41 = vpop.eup %4122 }
0x184d   :  { %2674 = vrot.lane.b32.xlu0 %v4123_v41, %s4300_s5 }
0x18bf   :  { %v2675_v42 = vpop.permute.xlu0 %2674 }
0x18c0   :  { %v2677_v25 = vmul.f32 %v4121_v37, %v2675_v42 }
0x18c2   :  { %2680 = vrot.lane.b32.xlu1 %v2677_v25, %s4293_s6 }
0x1934   :  { %v2681_v43 = vpop.permute.xlu1 %2680 }
0x1935   :  { %3805 = vmatmul.mubr.msk.f32.vlgmr.msra.gmra.mrb[26].mxu0 %vm928_vm3, %v2681_v43 }
0x1936   :  { %4008 = vmatpush3.bf16.msra.mxu0 %v4672_v28  ;;  %3826 = vmatprep.mubr.msk.f32.mxu0 %vm4298_vm0, %v4299_v2 }
0x1937   :  { %4009 = vmatprep.subr.bf16.mxu0 %v4297_v1 }
0x193a   :  { %4011 = vmatpush3.bf16.msra.mxu0 %v4679_v33 }
0x193b   :  { %4018 = vmatprep.subr.bf16.mxu0 %v4297_v1 }
0x1a08   :  { %v2750_v45 = vpop.f32.mrb[26].mxu0 }
0x1a09   :  { %v2754_v46 = vadd.f32 %v2750_v45, %v2678_v44  ;;  %v3806_v47 = vpop.f32.mrb[27].mxu0 }
0x1a0b   :  { %4124 = vtanh.f32 %v2754_v46  ;;  %v3385_v49 = vmul.f32 -1.442695, %v2754_v46 }
0x1a0d   :  { %4126 = vpow2.f32 %v3385_v49 }
0x1a15   :  { %v4125_v48 = vpop.eup %4124 }
0x1a16   :  { %2764 = vrot.lane.b32.xlu0 %v4125_v48, %s4300_s5 }
0x1a17   :  { %v4127_v50 = vpop.eup %4126 }
0x1a18   :  { %v2758_v51 = vadd.f32 1.0, %v4127_v50 }
0x1a1a   :  { %4128 = vrcp.f32 %v2758_v51 }
0x1a24   :  { %v4129_v52 = vpop.eup %4128 }
0x1a25   :  { %v2762_v55 = vmul.f32 %v4129_v52, %v2671_v40 }
0x1a88   :  { %v2765_v53 = vpop.permute.xlu0 %2764 }
0x1a89   :  { %v2767_v54 = vmul.f32 %v4129_v52, %v2765_v53 }
0x1a8b   :  { %2769 = vrot.lane.b32.xlu1 %v2767_v54, %s4293_s6 }
0x1afd   :  { %v2770_v56 = vpop.permute.xlu1 %2769 }
0x1afe   :  { %v2772_v57 = vadd.f32 %v2770_v56, %v2762_v55 }
0x1b00   :  { %4130 = vtanh.f32 %v2772_v57 }
0x1b0a   :  { %v4131_v58 = vpop.eup %4130 }
0x1b0b   :  { %2775 = vrot.lane.b32.xlu0 %v4131_v58, %s4300_s5 }
0x1b7d   :  { %v2776_v59 = vpop.permute.xlu0 %2775 }
0x1b7e   :  { %v2778_v60 = vmul.f32 %v4129_v52, %v2776_v59  ;;  %v3082_v52 = vld [vmem:[#allocation3 + $0xc] sm:$0x3] }
0x1b80   :  { %2781 = vrot.lane.b32.xlu1 %v2778_v60, %s4293_s6 }
0x1bf2   :  { %v2782_v61 = vpop.permute.xlu1 %2781 }
0x1bf3   :  { %3816 = vmatmul.mubr.msk.f32.vlgmr.msra.gmra.mrb[26].mxu1 %vm928_vm3, %v2782_v61 }
0x1bf4   :  { %4014 = vmatpush3.bf16.msra.mxu1 %v4672_v28  ;;  %3837 = vmatprep.mubr.msk.f32.mxu1 %vm4298_vm0, %v4299_v2 }
0x1bf5   :  { %4015 = vmatprep.subr.bf16.mxu1 %v4297_v1 }
0x1bf8   :  { %4017 = vmatpush3.bf16.msra.mxu1 %v4679_v33 }
0x1bf9   :  { %4024 = vmatprep.subr.bf16.mxu1 %v4297_v1 }
0x1cc6   :  { %v2851_v0 = vpop.f32.mrb[26].mxu1 }
0x1cc7   :  { %v2855_v3 = vadd.f32 %v2851_v0, %v2779_v63  ;;  %v3817_v4 = vpop.f32.mrb[27].mxu1 }
0x1cc9   :  { %4132 = vtanh.f32 %v2855_v3  ;;  %v3387_v6 = vmul.f32 -1.442695, %v2855_v3 }
0x1ccb   :  { %4134 = vpow2.f32 %v3387_v6 }
0x1cd3   :  { %v4133_v5 = vpop.eup %4132 }
0x1cd4   :  { %2865 = vrot.lane.b32.xlu0 %v4133_v5, %s4300_s5 }
0x1cd5   :  { %v4135_v7 = vpop.eup %4134 }
0x1cd6   :  { %v2859_v8 = vadd.f32 1.0, %v4135_v7 }
0x1cd8   :  { %4136 = vrcp.f32 %v2859_v8 }
0x1ce2   :  { %v4137_v9 = vpop.eup %4136 }
0x1ce3   :  { %v2863_v12 = vmul.f32 %v4137_v9, %v2772_v57 }
0x1d46   :  { %v2866_v10 = vpop.permute.xlu0 %2865 }
0x1d47   :  { %v2868_v11 = vmul.f32 %v4137_v9, %v2866_v10 }
0x1d49   :  { %2870 = vrot.lane.b32.xlu1 %v2868_v11, %s4293_s6 }
0x1dbb   :  { %v2871_v13 = vpop.permute.xlu1 %2870 }
0x1dbc   :  { %v2873_v14 = vadd.f32 %v2871_v13, %v2863_v12 }
0x1dbe   :  { %4138 = vtanh.f32 %v2873_v14 }
0x1dc8   :  { %v4139_v15 = vpop.eup %4138 }
0x1dc9   :  { %2876 = vrot.lane.b32.xlu0 %v4139_v15, %s4300_s5 }
0x1e3b   :  { %v2877_v16 = vpop.permute.xlu0 %2876 }
0x1e3c   :  { %v2879_v17 = vmul.f32 %v4137_v9, %v2877_v16  ;;  %v3183_v9 = vld [vmem:[#allocation3 + $0xe] sm:$0x3] }
0x1e3e   :  { %2882 = vrot.lane.b32.xlu1 %v2879_v17, %s4293_s6 }
0x1eb0   :  { %v2883_v18 = vpop.permute.xlu1 %2882 }
0x1eb1   :  { %3827 = vmatmul.mubr.msk.f32.vlgmr.msra.gmra.mrb[28].mxu0 %vm928_vm3, %v2883_v18 }
0x1eb2   :  { %4020 = vmatpush3.bf16.msra.mxu0 %v4672_v28  ;;  %3848 = vmatprep.mubr.msk.f32.mxu0 %vm4298_vm0, %v4299_v2 }
0x1eb3   :  { %4021 = vmatprep.subr.bf16.mxu0 %v4297_v1 }
0x1eb6   :  { %4023 = vmatpush3.bf16.msra.mxu0 %v4679_v33 }
0x1f84   :  { %v2952_v20 = vpop.f32.mrb[28].mxu0 }
0x1f85   :  { %v2956_v21 = vadd.f32 %v2952_v20, %v2880_v19  ;;  %v3828_v23 = vpop.f32.mrb[29].mxu0  ;;  %v3396_v20 = vld [vmem:[%s4813_s9] ss:$0 sm:$0xff] }
0x1f87   :  { %4140 = vtanh.f32 %v2956_v21  ;;  %v3389_v26 = vmul.f32 -1.442695, %v2956_v21 }
0x1f89   :  { %4142 = vpow2.f32 %v3389_v26 }
0x1f91   :  { %v4141_v24 = vpop.eup %4140 }
0x1f92   :  { %2966 = vrot.lane.b32.xlu0 %v4141_v24, %s4300_s5 }
0x1f93   :  { %v4143_v27 = vpop.eup %4142 }
0x1f94   :  { %v2960_v29 = vadd.f32 1.0, %v4143_v27 }
0x1f96   :  { %4144 = vrcp.f32 %v2960_v29 }
0x1fa0   :  { %v4145_v30 = vpop.eup %4144 }
0x1fa1   :  { %v2964_v34 = vmul.f32 %v4145_v30, %v2873_v14 }
0x2004   :  { %v2967_v31 = vpop.permute.xlu0 %2966 }
0x2005   :  { %v2969_v32 = vmul.f32 %v4145_v30, %v2967_v31 }
0x2007   :  { %2971 = vrot.lane.b32.xlu1 %v2969_v32, %s4293_s6 }
0x2079   :  { %v2972_v35 = vpop.permute.xlu1 %2971 }
0x207a   :  { %v2974_v36 = vadd.f32 %v2972_v35, %v2964_v34  ;;  %v3397_v35 = vld [vmem:[#allocation4] ss:$0 sm:$0xff] }
0x207c   :  { %4146 = vtanh.f32 %v2974_v36 }
0x2086   :  { %v4147_v37 = vpop.eup %4146 }
0x2087   :  { %2977 = vrot.lane.b32.xlu0 %v4147_v37, %s4300_s5 }
0x20f9   :  { %v2978_v38 = vpop.permute.xlu0 %2977 }
0x20fa   :  { %v2980_v22 = vmul.f32 %v4145_v30, %v2978_v38 }
0x20fc   :  { %2983 = vrot.lane.b32.xlu1 %v2980_v22, %s4293_s6 }
0x216e   :  { %v2984_v62 = vpop.permute.xlu1 %2983 }
0x216f   :  { %3838 = vmatmul.mubr.msk.f32.vlgmr.msra.gmra.mrb[28].mxu1 %vm928_vm3, %v2984_v62 }
0x2170   :  { %4026 = vmatpush3.bf16.msra.mxu1 %v4672_v28  ;;  %3859 = vmatprep.mubr.msk.f32.mxu1 %vm4298_vm0, %v4299_v2 }
0x2171   :  { %4027 = vmatprep.subr.bf16.mxu1 %v4297_v1 }
0x2174   :  { %4029 = vmatpush3.bf16.msra.mxu1 %v4679_v33 }
0x2242   :  { %v3053_v40 = vpop.f32.mrb[28].mxu1 }
0x2243   :  { %v3057_v41 = vadd.f32 %v3053_v40, %v2981_v39  ;;  %v3839_v42 = vpop.f32.mrb[29].mxu1 }
0x2245   :  { %4148 = vtanh.f32 %v3057_v41  ;;  %v3391_v43 = vmul.f32 -1.442695, %v3057_v41 }
0x2247   :  { %4150 = vpow2.f32 %v3391_v43 }
0x224f   :  { %v4149_v25 = vpop.eup %4148 }
0x2250   :  { %3067 = vrot.lane.b32.xlu0 %v4149_v25, %s4300_s5 }
0x2251   :  { %v4151_v44 = vpop.eup %4150 }
0x2252   :  { %v3061_v45 = vadd.f32 1.0, %v4151_v44 }
0x2254   :  { %4152 = vrcp.f32 %v3061_v45 }
0x225e   :  { %v4153_v28 = vpop.eup %4152 }
0x225f   :  { %v3065_v1 = vmul.f32 %v4153_v28, %v2974_v36 }
0x22c2   :  { %v3068_v46 = vpop.permute.xlu0 %3067 }
0x22c3   :  { %v3070_v2 = vmul.f32 %v4153_v28, %v3068_v46 }
0x22c5   :  { %3072 = vrot.lane.b32.xlu1 %v3070_v2, %s4293_s6 }
0x2337   :  { %v3073_v33 = vpop.permute.xlu1 %3072 }
0x2338   :  { %v3075_v47 = vadd.f32 %v3073_v33, %v3065_v1 }
0x233a   :  { %4154 = vtanh.f32 %v3075_v47 }
0x2344   :  { %v4155_v48 = vpop.eup %4154 }
0x2345   :  { %3078 = vrot.lane.b32.xlu0 %v4155_v48, %s4300_s5 }
0x23b7   :  { %v3079_v49 = vpop.permute.xlu0 %3078 }
0x23b8   :  { %v3081_v50 = vmul.f32 %v4153_v28, %v3079_v49 }
0x23ba   :  { %3084 = vrot.lane.b32.xlu1 %v3081_v50, %s4293_s6 }
0x242c   :  { %v3085_v51 = vpop.permute.xlu1 %3084 }
0x242d   :  { %3849 = vmatmul.mubr.msk.f32.vlgmr.msra.gmra.mrb[30].mxu0 %vm928_vm3, %v3085_v51 }
0x2500   :  { %v3154_v53 = vpop.f32.mrb[30].mxu0 }
0x2501   :  { %v3158_v54 = vadd.f32 %v3154_v53, %v3082_v52  ;;  %v3850_v55 = vpop.f32.mrb[31].mxu0 }
0x2503   :  { %4156 = vtanh.f32 %v3158_v54  ;;  %v3393_v57 = vmul.f32 -1.442695, %v3158_v54 }
0x2505   :  { %4158 = vpow2.f32 %v3393_v57 }
0x250d   :  { %v4157_v56 = vpop.eup %4156 }
0x250e   :  { %3168 = vrot.lane.b32.xlu0 %v4157_v56, %s4300_s5 }
0x250f   :  { %v4159_v58 = vpop.eup %4158 }
0x2510   :  { %v3162_v59 = vadd.f32 1.0, %v4159_v58 }
0x2512   :  { %4160 = vrcp.f32 %v3162_v59 }
0x251c   :  { %v4161_v60 = vpop.eup %4160 }
0x251d   :  { %v3166_v0 = vmul.f32 %v4161_v60, %v3075_v47 }
0x2580   :  { %v3169_v61 = vpop.permute.xlu0 %3168 }
0x2581   :  { %v3171_v63 = vmul.f32 %v4161_v60, %v3169_v61 }
0x2583   :  { %3173 = vrot.lane.b32.xlu1 %v3171_v63, %s4293_s6 }
0x25f5   :  { %v3174_v3 = vpop.permute.xlu1 %3173 }
0x25f6   :  { %v3176_v4 = vadd.f32 %v3174_v3, %v3166_v0 }
0x25f8   :  { %4162 = vtanh.f32 %v3176_v4 }
0x2602   :  { %v4163_v5 = vpop.eup %4162 }
0x2603   :  { %3179 = vrot.lane.b32.xlu0 %v4163_v5, %s4300_s5 }
0x2675   :  { %v3180_v6 = vpop.permute.xlu0 %3179 }
0x2676   :  { %v3182_v7 = vmul.f32 %v4161_v60, %v3180_v6 }
0x2678   :  { %3185 = vrot.lane.b32.xlu1 %v3182_v7, %s4293_s6 }
0x26ea   :  { %v3186_v8 = vpop.permute.xlu1 %3185 }
0x26eb   :  { %3860 = vmatmul.mubr.msk.f32.vlgmr.msra.gmra.mrb[30].mxu1 %vm928_vm3, %v3186_v8 }
0x27be   :  { %v3255_v10 = vpop.f32.mrb[30].mxu1 }
0x27bf   :  { %v3259_v11 = vadd.f32 %v3255_v10, %v3183_v9  ;;  %v3861_v12 = vpop.f32.mrb[31].mxu1 }
0x27c1   :  { %4164 = vtanh.f32 %v3259_v11  ;;  %v3395_v14 = vmul.f32 -1.442695, %v3259_v11 }
0x27c3   :  { %4166 = vpow2.f32 %v3395_v14 }
0x27cb   :  { %v4165_v13 = vpop.eup %4164 }
0x27cc   :  { %3269 = vrot.lane.b32.xlu0 %v4165_v13, %s4300_s5 }
0x27cd   :  { %v4167_v15 = vpop.eup %4166 }
0x27ce   :  { %v3263_v16 = vadd.f32 1.0, %v4167_v15 }
0x27d0   :  { %4168 = vrcp.f32 %v3263_v16 }
0x27da   :  { %v4169_v17 = vpop.eup %4168 }
0x27db   :  { %v3267_v21 = vmul.f32 %v4169_v17, %v3176_v4 }
0x283e   :  { %v3270_v18 = vpop.permute.xlu0 %3269 }
0x283f   :  { %v3272_v19 = vmul.f32 %v4169_v17, %v3270_v18 }
0x2841   :  { %3274 = vrot.lane.b32.xlu1 %v3272_v19, %s4293_s6 }
0x2845   :  { %3290 = vrot.lane.b32.xlu1 %v3396_v20, %s4301_s26 }
0x28b3   :  { %v3275_v23 = vpop.permute.xlu1 %3274 }
0x28b4   :  { %v3277_v24 = vadd.f32 %v3275_v23, %v3267_v21 }
0x28b6   :  { %4170 = vtanh.f32 %v3277_v24 }
0x28b7   :  { %v3291_v29 = vpop.permute.xlu1 %3290 }
0x28c0   :  { %v4171_v26 = vpop.eup %4170 }
0x28c1   :  { %3280 = vrot.lane.b32.xlu0 %v4171_v26, %s4300_s5 }
0x2933   :  { %v3281_v27 = vpop.permute.xlu0 %3280 }
0x2934   :  { %v3283_v30 = vmul.f32 %v4169_v17, %v3281_v27 }
0x2936   :  { %v3293_v31 = vmul.f32 %v3291_v29, %v3283_v30 }
0x2938   :  { %3295 = vrot.lane.b32.xlu0 %v3293_v31, %s4293_s6 }
0x29aa   :  { %v3296_v32 = vpop.permute.xlu0 %3295 }
0x29ab   :  { %v3298_v34 = vsel %vm1031_vm2, %v3296_v32, 0.0 }
0x29ac   :  { %3299 = vadd.xlane.f32.xlu1 %v3298_v34 }
0x2a39   :  { %v3300_v36 = vpop.xlane.xlu1 %3299 }
0x2a3a   :  { %v3308_v37 = vadd.f32 %v3397_v35, %v3300_v36 }
0x2a3c   :  { %3310 = vst.msk [vmem:[%s4815_s11] sm:$0x3] %vm3309_vm4, %v3308_v37 }
0x2a3d   :  { %3315 = vsyncpa [#allocation6], 1 }
0x2a3e   :  { %3316 = vsyncpa [#allocation8], 1 }
0x2a3f   :  { %3317 = vsyncpa [#allocation11], 1 }

</bundles_post_ra>
